<compile_context>
chip_gen: v7x
topology: tpu7x:2x2x1
jax: 0.10.0
libtpu: 0.0.40
codegen_flags: <defaults>
</compile_context>

<pallas_src>
import math

import jax
import jax.numpy as jnp
from jax import lax
from jax.experimental import pallas as pl
from jax.experimental.pallas import tpu as pltpu

_MIN_VMEM_LIMIT = 16 * 1024 * 1024


def _vmem_limit(block_bytes, scratch_bytes=0):
    # Double-buffered pipeline blocks + scratch (+ estimated spilled f32 tiles),
    # ~25% headroom, 16 MiB floor.
    est = int((2 * block_bytes + scratch_bytes) * 1.25)
    return max(est, _MIN_VMEM_LIMIT)


def _fit_tile(dim, pref, mult=8):
    """Largest tile <= pref dividing dim, preferring hardware-aligned multiples."""
    pref = min(pref, dim)
    if dim % pref == 0:
        return pref
    for t in range(pref, 0, -1):
        if dim % t == 0 and t % mult == 0:
            return t
    return dim  # full dim is always a legal block


def _pick_heads_per_block(n_heads, head_dim, max_lanes=512):
    """Largest head group whose merged lane width is a multiple of 128 (<= max_lanes)."""
    cands = [d for d in range(1, n_heads + 1)
             if n_heads % d == 0 and (d * head_dim) % 128 == 0 and d * head_dim <= max_lanes]
    return max(cands) if cands else n_heads


# ---------------------------------------------------------------------------
# Linear: out = x @ W^T with W kept in PyTorch nn.Linear layout (N, K).
# bf16 operands, f32 MXU accumulation.  Large row tiles keep the weight
# stream compute-bound (roofline crossover ~660 flops/byte on v6e).
# ---------------------------------------------------------------------------
def _linear_nt_kernel(x_ref, w_ref, o_ref):
    # x_ref: (TM, K) bf16 ; w_ref: (TN, K) bf16 ; o_ref: (TM, TN)
    o_ref[...] = lax.dot_general(
        x_ref[...], w_ref[...],
        dimension_numbers=(((1,), (1,)), ((), ())),   # contract K with K -> x @ W^T
        preferred_element_type=jnp.float32,
    ).astype(o_ref.dtype)


def _linear_nt(x2d, w, out_dtype, tm=1024, tn=512):
    """x2d: (M, K) bf16, w: (N, K) bf16 (PyTorch layout). Returns (M, N) out_dtype."""
    M, K = x2d.shape
    N, Kw = w.shape
    assert K == Kw
    tm = _fit_tile(M, tm, mult=8)
    tn = _fit_tile(N, tn, mult=128)
    # TODO(synk): for very large K (C >= ~4096) add a K-reduction grid axis with a
    # VMEM accumulator instead of streaming the full-K weight tile per step.
    block_bytes = (tm * K + tn * K) * 2 + tm * tn * jnp.dtype(out_dtype).itemsize
    return pl.pallas_call(
        _linear_nt_kernel,
        out_shape=jax.ShapeDtypeStruct((M, N), out_dtype),
        grid_spec=pltpu.PrefetchScalarGridSpec(
            num_scalar_prefetch=0,
            grid=(M // tm, N // tn),
            in_specs=[
                pl.BlockSpec((tm, K), lambda i, j: (i, 0)),
                pl.BlockSpec((tn, K), lambda i, j: (j, 0)),
            ],
            out_specs=pl.BlockSpec((tm, tn), lambda i, j: (i, j)),
        ),
        compiler_params=pltpu.CompilerParams(
            dimension_semantics=("parallel", "parallel"),
            vmem_limit_bytes=_vmem_limit(block_bytes)),
    )(x2d, w)


# ---------------------------------------------------------------------------
# Flash attention over a causal-only flattened grid.
#   grid = (B, head-groups, causal steps); step -> (qi, kvi) via scalar prefetch.
#   Online softmax state (m, l, acc) in VMEM scratch, head-batched matmuls,
#   lane-dense (B, T, C) output written directly by the kernel.
# ---------------------------------------------------------------------------
def _make_flash_kernel(tq, tkv):
    def kernel(qi_ref, kvi_ref, q_ref, k_ref, v_ref, o_ref, m_ref, l_ref, acc_ref):
        s_idx = pl.program_id(2)
        qi = qi_ref[s_idx]
        kvi = kvi_ref[s_idx]

        @pl.when(kvi == 0)
        def _init():
            m_ref[...] = jnp.full_like(m_ref, -1e30)
            l_ref[...] = jnp.zeros_like(l_ref)
            acc_ref[...] = jnp.zeros_like(acc_ref)

        def _accumulate(apply_mask):
            q = q_ref[...]            # (Hsub, TQ, Dh) bf16 (1/sqrt(Dh) folded into Wq)
            k = k_ref[...]            # (Hsub, TKV, Dh) bf16
            v = v_ref[...]            # (Hsub, TKV, Dh) bf16
            # s[h] = q[h] @ k[h]^T  — leading batch dim, contracting head_dim.
            s = lax.dot_general(q, k, (((2,), (2,)), ((0,), (0,))),
                                preferred_element_type=jnp.float32)   # (Hsub, TQ, TKV)
            if apply_mask:
                # GLOBAL indices so tq != tkv stays correct.
                row = qi * tq + lax.broadcasted_iota(jnp.int32, s.shape, 1)
                col = kvi * tkv + lax.broadcasted_iota(jnp.int32, s.shape, 2)
                s = jnp.where(col <= row, s, -1e30)
            m_prev = m_ref[...]
            m_new = jnp.maximum(m_prev, jnp.max(s, axis=-1, keepdims=True))
            alpha = jnp.exp(m_prev - m_new)
            p = jnp.exp(s - m_new)
            l_ref[...] = alpha * l_ref[...] + jnp.sum(p, axis=-1, keepdims=True)
            acc_ref[...] = alpha * acc_ref[...] + lax.dot_general(
                p.astype(v.dtype), v, (((2,), (1,)), ((0,), (0,))),
                preferred_element_type=jnp.float32)
            m_ref[...] = m_new

        # Mask only blocks that actually straddle the diagonal.
        need_mask = (kvi + 1) * tkv - 1 > qi * tq

        @pl.when(jnp.logical_not(need_mask))
        def _no_mask():
            _accumulate(apply_mask=False)

        @pl.when(need_mask)
        def _with_mask():
            _accumulate(apply_mask=True)

        # Last kv block for this q tile -> normalize and emit a lane-dense row slab.
        is_last = (kvi + 1) * tkv >= (qi + 1) * tq

        @pl.when(is_last)
        def _finalize():
            hsub = acc_ref.shape[0]
            inv_l = pl.reciprocal(l_ref[...], approx=True)   # EUP slot, frees VALU
            res = (acc_ref[...] * inv_l).astype(o_ref.dtype)  # (Hsub, TQ, Dh)
            # Heads side-by-side along lanes -> (TQ, Hsub*Dh), one wide store.
            o_ref[...] = jnp.concatenate([res[h] for h in range(hsub)], axis=-1)

    return kernel


def _flash_attention(qkv_t, *, tq=256, tkv=512, heads_per_block=None):
    """qkv_t: (B, 3, H, T, Dh) bf16 (scale already folded into Q rows of the weight).

    Returns (B, T, H*Dh) bf16 with heads merged (lane-dense), ready for the out proj.
    """
    B, three, H, T, Dh = qkv_t.shape
    assert three == 3
    C = H * Dh
    tq = _fit_tile(T, tq, mult=8)
    tkv = _fit_tile(T, tkv, mult=8)
    hsub = heads_per_block or _pick_heads_per_block(H, Dh)
    assert H % hsub == 0
    assert (hsub * Dh) % 128 == 0 or hsub * Dh == C, "flash output block must be lane-dense"

    # Enumerate ONLY the causal (q-tile, kv-tile) pairs.
    n_q = T // tq
    qi_list, kvi_list = [], []
    for qi in range(n_q):
        for kvi in range(((qi + 1) * tq - 1) // tkv + 1):
            qi_list.append(qi)
            kvi_list.append(kvi)
    n_steps = len(qi_list)
    qi_map = jnp.asarray(qi_list, dtype=jnp.int32)
    kvi_map = jnp.asarray(kvi_list, dtype=jnp.int32)

    q_spec = pl.BlockSpec((None, None, hsub, tq, Dh),
                          lambda b, hg, s, qi, kvi: (b, 0, hg, qi[s], 0))
    k_spec = pl.BlockSpec((None, None, hsub, tkv, Dh),
                          lambda b, hg, s, qi, kvi: (b, 1, hg, kvi[s], 0))
    v_spec = pl.BlockSpec((None, None, hsub, tkv, Dh),
                          lambda b, hg, s, qi, kvi: (b, 2, hg, kvi[s], 0))
    o_spec = pl.BlockSpec((None, tq, hsub * Dh),
                          lambda b, hg, s, qi, kvi: (b, qi[s], hg))

    # VMEM budget: double-buffered blocks + persistent scratch + estimated spilled
    # f32 score/p tiles.  Defaults stay well under the v7x 64 MiB per-core budget.
    block_bytes = (hsub * tq * Dh + 2 * hsub * tkv * Dh + hsub * tq * Dh) * 2
    scratch_bytes = (2 * hsub * tq * 128 + hsub * tq * Dh) * 4   # m/l lane-padded + acc
    spill_bytes = 2 * hsub * tq * tkv * 4                        # s and p f32 tiles

    return pl.pallas_call(
        _make_flash_kernel(tq, tkv),
        out_shape=jax.ShapeDtypeStruct((B, T, C), jnp.bfloat16),
        grid_spec=pltpu.PrefetchScalarGridSpec(
            num_scalar_prefetch=2,
            grid=(B, H // hsub, n_steps),
            in_specs=[q_spec, k_spec, v_spec],
            out_specs=o_spec,
            scratch_shapes=[
                pltpu.VMEM((hsub, tq, 1), jnp.float32),   # running max
                pltpu.VMEM((hsub, tq, 1), jnp.float32),   # running sum
                pltpu.VMEM((hsub, tq, Dh), jnp.float32),  # output accumulator
            ]),
        compiler_params=pltpu.CompilerParams(
            dimension_semantics=("parallel", "parallel", "arbitrary"),
            vmem_limit_bytes=_vmem_limit(block_bytes, scratch_bytes + spill_bytes)),
    )(qi_map, kvi_map, qkv_t, qkv_t, qkv_t)


# ---------------------------------------------------------------------------
# Module wrapper.
# ---------------------------------------------------------------------------
def init_mha_params(w_qkv, w_proj, n_heads):
    """One-time parameter prep (hoisted out of the forward call):
    fold 1/sqrt(Dh) into the Q rows of the QKV weight and cast to bf16."""
    C = w_proj.shape[0]
    Dh = C // n_heads
    scale_col = jnp.concatenate([
        jnp.full((C,), 1.0 / math.sqrt(Dh), dtype=w_qkv.dtype),
        jnp.ones((2 * C,), dtype=w_qkv.dtype),
    ])
    return {
        "w_qkv": (w_qkv * scale_col[:, None]).astype(jnp.bfloat16),   # (3C, C)
        "w_proj": w_proj.astype(jnp.bfloat16),                        # (C, C)
    }


def multi_head_attention(x, params, *, n_heads):
    """Forward pass of the PyTorch MultiHeadAttention module (eval mode).

    x: (B, T, C) float32; params from init_mha_params (PyTorch nn.Linear layout).
    """
    B, T, C = x.shape
    H = n_heads
    Dh = C // H
    assert H * Dh == C

    x_b = x.astype(jnp.bfloat16).reshape(B * T, C)

    # QKV projection (bf16 output halves DMA into the attention kernel).
    qkv = _linear_nt(x_b, params["w_qkv"], out_dtype=jnp.bfloat16)       # (B*T, 3C)

    # Single fused layout pass to head-major contiguous (t, Dh) tiles.
    qkv_t = jnp.transpose(qkv.reshape(B, T, 3, H, Dh), (0, 2, 3, 1, 4))  # (B,3,H,T,Dh)

    # Flash attention writes a lane-dense merged-heads (B, T, C) result directly.
    y = _flash_attention(qkv_t)                                          # (B, T, C) bf16

    # TODO(synk): attn_drop / resid_drop are identity in eval mode; dropout omitted.

    out = _linear_nt(y.reshape(B * T, C), params["w_proj"], out_dtype=x.dtype)
    return out.reshape(B, T, C)


def _reference(x, w_qkv, w_proj, n_heads):
    B, T, C = x.shape
    Dh = C // n_heads
    qkv = x @ w_qkv.T
    q, k, v = jnp.split(qkv, 3, axis=2)

    def heads(t):
        return t.reshape(B, T, n_heads, Dh).transpose(0, 2, 1, 3)

    q, k, v = heads(q), heads(k), heads(v)
    att = (q @ k.transpose(0, 1, 3, 2)) / math.sqrt(Dh)
    mask = jnp.tril(jnp.ones((T, T), dtype=bool))
    att = jnp.where(mask[None, None], att, -jnp.inf)
    att = jax.nn.softmax(att, axis=-1)
    y = att @ v
    y = y.transpose(0, 2, 1, 3).reshape(B, T, C)
    return y @ w_proj.T


if __name__ == "__main__":
    cfg = {"n_heads": 4, "emb_dim": 32, "drop_rate": 0.0, "context_length": 8}
    B, T, C = 2, 8, cfg["emb_dim"]

    key = jax.random.PRNGKey(0)
    kx, kq, kp = jax.random.split(key, 3)
    x = jax.random.normal(kx, (B, T, C), dtype=jnp.float32)
    # Deterministic parameter init (nn.Linear-like uniform scaling).
    bound = 1.0 / math.sqrt(C)
    w_qkv = jax.random.uniform(kq, (3 * C, C), jnp.float32, -bound, bound)
    w_proj = jax.random.uniform(kp, (C, C), jnp.float32, -bound, bound)

    # Parameter prep is done once, outside the forward path.
    params = init_mha_params(w_qkv, w_proj, cfg["n_heads"])

    fwd = jax.jit(lambda xx, pp: multi_head_attention(xx, pp, n_heads=cfg["n_heads"]))
    out = jax.block_until_ready(fwd(x, params))

    ref = _reference(x, w_qkv, w_proj, cfg["n_heads"])
    assert out.shape == (B, T, C)
    # bf16 MXU operands (f32 accumulation) + approx reciprocal -> bf16-level tolerance.
    assert jnp.allclose(out, ref, atol=3e-2, rtol=3e-2), "mismatch vs reference"
    print("KERNEL_OK")
</pallas_src>

<mosaic_0001>
module attributes {stable_mosaic.version = 11 : i64} {
  func.func @_linear_nt_kernel(%arg0: i32, %arg1: i32, %arg2: memref<16x32xbf16, #tpu.memory_space<vmem>>, %arg3: memref<96x32xbf16, #tpu.memory_space<vmem>>, %arg4: memref<16x96xbf16, #tpu.memory_space<vmem>>) attributes {dimension_semantics = [#tpu.dimension_semantics<parallel>, #tpu.dimension_semantics<parallel>], iteration_bounds = array<i64: 1, 1>, scalar_prefetch = 0 : i64, scratch_operands = 0 : i64, tpu.core_type = #tpu.core_type<tc>, window_params = [{transform_indices = @transform_0, window_bounds = array<i64: 16, 32>}, {transform_indices = @transform_1, window_bounds = array<i64: 96, 32>}, {transform_indices = @transform_2, window_bounds = array<i64: 16, 96>}]} {
    %c0 = arith.constant 0 : index
    %c0_0 = arith.constant 0 : index
    %0 = vector.load %arg2[%c0, %c0_0] : memref<16x32xbf16, #tpu.memory_space<vmem>>, vector<16x32xbf16>
    %c0_1 = arith.constant 0 : index
    %c0_2 = arith.constant 0 : index
    %1 = vector.load %arg3[%c0_1, %c0_2] : memref<96x32xbf16, #tpu.memory_space<vmem>>, vector<96x32xbf16>
    %cst = arith.constant dense<0.000000e+00> : vector<16x96xf32>
    %2 = tpu.matmul %0, %1, %cst {dimension_numbers = #tpu.dot_dimension_numbers<[1], [1], [0], [0], [0, 0, 1, 0], [], []>} : vector<16x32xbf16>, vector<96x32xbf16>, vector<16x96xf32> -> vector<16x96xf32>
    %3 = arith.truncf %2 : vector<16x96xf32> to vector<16x96xbf16>
    %c0_3 = arith.constant 0 : index
    %c0_4 = arith.constant 0 : index
    %4 = vector.load %arg4[%c0_3, %c0_4] : memref<16x96xbf16, #tpu.memory_space<vmem>>, vector<16x96xbf16>
    tpu.vector_store %arg4[%c0_3, %c0_4], %3 {strides = array<i32>} : memref<16x96xbf16, #tpu.memory_space<vmem>>, vector<16x96xbf16>,
    return
  }
  func.func @transform_0(%arg0: i32, %arg1: i32) -> (i32, i32) {
    %c0_i32 = arith.constant 0 : i32
    %c0_i32_0 = arith.constant 0 : i32
    return %arg0, %c0_i32 : i32, i32
  }
  func.func @transform_1(%arg0: i32, %arg1: i32) -> (i32, i32) {
    %c0_i32 = arith.constant 0 : i32
    %c0_i32_0 = arith.constant 0 : i32
    return %arg1, %c0_i32 : i32, i32
  }
  func.func @transform_2(%arg0: i32, %arg1: i32) -> (i32, i32) {
    %c0_i32 = arith.constant 0 : i32
    return %arg0, %arg1 : i32, i32
  }
}

module attributes {stable_mosaic.version = 11 : i64} {
  func.func @_linear_nt_kernel(%arg0: i32, %arg1: i32, %arg2: memref<16x32xbf16, #tpu.memory_space<vmem>>, %arg3: memref<32x32xbf16, #tpu.memory_space<vmem>>, %arg4: memref<16x32xf32, #tpu.memory_space<vmem>>) attributes {dimension_semantics = [#tpu.dimension_semantics<parallel>, #tpu.dimension_semantics<parallel>], iteration_bounds = array<i64: 1, 1>, scalar_prefetch = 0 : i64, scratch_operands = 0 : i64, tpu.core_type = #tpu.core_type<tc>, window_params = [{transform_indices = @transform_0, window_bounds = array<i64: 16, 32>}, {transform_indices = @transform_1, window_bounds = array<i64: 32, 32>}, {transform_indices = @transform_2, window_bounds = array<i64: 16, 32>}]} {
    %c0 = arith.constant 0 : index
    %c0_0 = arith.constant 0 : index
    %0 = vector.load %arg2[%c0, %c0_0] : memref<16x32xbf16, #tpu.memory_space<vmem>>, vector<16x32xbf16>
    %c0_1 = arith.constant 0 : index
    %c0_2 = arith.constant 0 : index
    %1 = vector.load %arg3[%c0_1, %c0_2] : memref<32x32xbf16, #tpu.memory_space<vmem>>, vector<32x32xbf16>
    %cst = arith.constant dense<0.000000e+00> : vector<16x32xf32>
    %2 = tpu.matmul %0, %1, %cst {dimension_numbers = #tpu.dot_dimension_numbers<[1], [1], [0], [0], [0, 0, 1, 0], [], []>} : vector<16x32xbf16>, vector<32x32xbf16>, vector<16x32xf32> -> vector<16x32xf32>
    %c0_3 = arith.constant 0 : index
    %c0_4 = arith.constant 0 : index
    %3 = vector.load %arg4[%c0_3, %c0_4] : memref<16x32xf32, #tpu.memory_space<vmem>>, vector<16x32xf32>
    tpu.vector_store %arg4[%c0_3, %c0_4], %2 {strides = array<i32>} : memref<16x32xf32, #tpu.memory_space<vmem>>, vector<16x32xf32>,
    return
  }
  func.func @transform_0(%arg0: i32, %arg1: i32) -> (i32, i32) {
    %c0_i32 = arith.constant 0 : i32
    %c0_i32_0 = arith.constant 0 : i32
    return %arg0, %c0_i32 : i32, i32
  }
  func.func @transform_1(%arg0: i32, %arg1: i32) -> (i32, i32) {
    %c0_i32 = arith.constant 0 : i32
    %c0_i32_0 = arith.constant 0 : i32
    return %arg1, %c0_i32 : i32, i32
  }
  func.func @transform_2(%arg0: i32, %arg1: i32) -> (i32, i32) {
    %c0_i32 = arith.constant 0 : i32
    return %arg0, %arg1 : i32, i32
  }
}

module attributes {stable_mosaic.version = 11 : i64} {
  func.func @kernel(%arg0: i32, %arg1: i32, %arg2: i32, %arg3: memref<1xi32, #tpu.memory_space<smem>>, %arg4: memref<1xi32, #tpu.memory_space<smem>>, %arg5: memref<1x1x4x8x8xbf16, #tpu.memory_space<vmem>>, %arg6: memref<1x1x4x8x8xbf16, #tpu.memory_space<vmem>>, %arg7: memref<1x1x4x8x8xbf16, #tpu.memory_space<vmem>>, %arg8: memref<1x8x32xbf16, #tpu.memory_space<vmem>>, %arg9: memref<4x8x1xf32, #tpu.memory_space<vmem>>, %arg10: memref<4x8x1xf32, #tpu.memory_space<vmem>>, %arg11: memref<4x8x8xf32, #tpu.memory_space<vmem>>) attributes {dimension_semantics = [#tpu.dimension_semantics<parallel>, #tpu.dimension_semantics<parallel>, #tpu.dimension_semantics<arbitrary>], iteration_bounds = array<i64: 2, 1, 1>, scalar_prefetch = 2 : i64, scratch_operands = 3 : i64, tpu.core_type = #tpu.core_type<tc>, window_params = [{transform_indices = @transform_0, window_bounds = array<i64: 1, 1, 4, 8, 8>}, {transform_indices = @transform_1, window_bounds = array<i64: 1, 1, 4, 8, 8>}, {transform_indices = @transform_2, window_bounds = array<i64: 1, 1, 4, 8, 8>}, {transform_indices = @transform_3, window_bounds = array<i64: 1, 8, 32>}]} {
    %0 = arith.index_cast %arg2 : i32 to index
    %1 = memref.load %arg3[%0] : memref<1xi32, #tpu.memory_space<smem>>
    %2 = arith.index_cast %arg2 : i32 to index
    %3 = memref.load %arg4[%2] : memref<1xi32, #tpu.memory_space<smem>>
    %c0_i32 = arith.constant 0 : i32
    %4 = arith.cmpi eq, %3, %c0_i32 : i32
    %5 = arith.extui %4 : i1 to i32
    %c0_i32_0 = arith.constant 0 : i32
    %6 = arith.cmpi ne, %5, %c0_i32_0 : i32
    scf.if %6 {
      %cst = arith.constant -1.000000e+30 : f32
      %24 = vector.broadcast %cst : f32 to vector<4x8x1xf32>
      %c0 = arith.constant 0 : index
      %c0_10 = arith.constant 0 : index
      %c0_11 = arith.constant 0 : index
      %25 = vector.load %arg9[%c0, %c0_10, %c0_11] : memref<4x8x1xf32, #tpu.memory_space<vmem>>, vector<4x8x1xf32>
      tpu.vector_store %arg9[%c0, %c0_10, %c0_11], %24 {strides = array<i32>} : memref<4x8x1xf32, #tpu.memory_space<vmem>>, vector<4x8x1xf32>,
      %cst_12 = arith.constant 0.000000e+00 : f32
      %26 = vector.broadcast %cst_12 : f32 to vector<4x8x1xf32>
      %c0_13 = arith.constant 0 : index
      %c0_14 = arith.constant 0 : index
      %c0_15 = arith.constant 0 : index
      %27 = vector.load %arg10[%c0_13, %c0_14, %c0_15] : memref<4x8x1xf32, #tpu.memory_space<vmem>>, vector<4x8x1xf32>
      tpu.vector_store %arg10[%c0_13, %c0_14, %c0_15], %26 {strides = array<i32>} : memref<4x8x1xf32, #tpu.memory_space<vmem>>, vector<4x8x1xf32>,
      %cst_16 = arith.constant 0.000000e+00 : f32
      %28 = vector.broadcast %cst_16 : f32 to vector<4x8x8xf32>
      %c0_17 = arith.constant 0 : index
      %c0_18 = arith.constant 0 : index
      %c0_19 = arith.constant 0 : index
      %29 = vector.load %arg11[%c0_17, %c0_18, %c0_19] : memref<4x8x8xf32, #tpu.memory_space<vmem>>, vector<4x8x8xf32>
      tpu.vector_store %arg11[%c0_17, %c0_18, %c0_19], %28 {strides = array<i32>} : memref<4x8x8xf32, #tpu.memory_space<vmem>>, vector<4x8x8xf32>,
    } else {
    }
    %c1_i32 = arith.constant 1 : i32
    %7 = arith.addi %3, %c1_i32 : i32
    %c8_i32 = arith.constant 8 : i32
    %8 = arith.muli %7, %c8_i32 : i32
    %c1_i32_1 = arith.constant 1 : i32
    %9 = arith.subi %8, %c1_i32_1 : i32
    %c8_i32_2 = arith.constant 8 : i32
    %10 = arith.muli %1, %c8_i32_2 : i32
    %11 = arith.cmpi sgt, %9, %10 : i32
    %true = arith.constant true
    %12 = arith.xori %11, %true : i1
    %13 = arith.extui %12 : i1 to i32
    %c0_i32_3 = arith.constant 0 : i32
    %14 = arith.cmpi ne, %13, %c0_i32_3 : i32
    scf.if %14 {
      %c0 = arith.constant 0 : index
      %c0_10 = arith.constant 0 : index
      %c0_11 = arith.constant 0 : index
      %c0_12 = arith.constant 0 : index
      %c0_13 = arith.constant 0 : index
      %24 = vector.load %arg5[%c0, %c0_10, %c0_11, %c0_12, %c0_13] : memref<1x1x4x8x8xbf16, #tpu.memory_space<vmem>>, vector<1x1x4x8x8xbf16>
      %25 = vector.shape_cast %24 : vector<1x1x4x8x8xbf16> to vector<4x8x8xbf16>
      %c0_14 = arith.constant 0 : index
      %c0_15 = arith.constant 0 : index
      %c0_16 = arith.constant 0 : index
      %c0_17 = arith.constant 0 : index
      %c0_18 = arith.constant 0 : index
      %26 = vector.load %arg6[%c0_14, %c0_15, %c0_16, %c0_17, %c0_18] : memref<1x1x4x8x8xbf16, #tpu.memory_space<vmem>>, vector<1x1x4x8x8xbf16>
      %27 = vector.shape_cast %26 : vector<1x1x4x8x8xbf16> to vector<4x8x8xbf16>
      %c0_19 = arith.constant 0 : index
      %c0_20 = arith.constant 0 : index
      %c0_21 = arith.constant 0 : index
      %c0_22 = arith.constant 0 : index
      %c0_23 = arith.constant 0 : index
      %28 = vector.load %arg7[%c0_19, %c0_20, %c0_21, %c0_22, %c0_23] : memref<1x1x4x8x8xbf16, #tpu.memory_space<vmem>>, vector<1x1x4x8x8xbf16>
      %29 = vector.shape_cast %28 : vector<1x1x4x8x8xbf16> to vector<4x8x8xbf16>
      %cst = arith.constant dense<0.000000e+00> : vector<4x8x8xf32>
      %30 = tpu.matmul %25, %27, %cst {dimension_numbers = #tpu.dot_dimension_numbers<[2], [2], [1], [1], [0, 0, 0, 1, 1, 1], [0], [0]>} : vector<4x8x8xbf16>, vector<4x8x8xbf16>, vector<4x8x8xf32> -> vector<4x8x8xf32>
      %c0_24 = arith.constant 0 : index
      %c0_25 = arith.constant 0 : index
      %c0_26 = arith.constant 0 : index
      %31 = vector.load %arg9[%c0_24, %c0_25, %c0_26] : memref<4x8x1xf32, #tpu.memory_space<vmem>>, vector<4x8x1xf32>
      %cst_27 = arith.constant dense<0xFF800000> : vector<4x8xf32>
      %32 = vector.multi_reduction <maximumf>, %30, %cst_27 [2] : vector<4x8x8xf32> to vector<4x8xf32>
      %33 = vector.shape_cast %32 : vector<4x8xf32> to vector<4x8x1xf32>
      %34 = arith.maximumf %31, %33 : vector<4x8x1xf32>
      %35 = arith.subf %31, %34 : vector<4x8x1xf32>
      %36 = math.exp %35 : vector<4x8x1xf32>
      %37 = vector.broadcast %34 : vector<4x8x1xf32> to vector<4x8x8xf32>
      %38 = arith.subf %30, %37 : vector<4x8x8xf32>
      %39 = math.exp %38 : vector<4x8x8xf32>
      %c0_28 = arith.constant 0 : index
      %c0_29 = arith.constant 0 : index
      %c0_30 = arith.constant 0 : index
      %40 = vector.load %arg10[%c0_28, %c0_29, %c0_30] : memref<4x8x1xf32, #tpu.memory_space<vmem>>, vector<4x8x1xf32>
      %41 = arith.mulf %36, %40 : vector<4x8x1xf32>
      %cst_31 = arith.constant dense<0.000000e+00> : vector<4x8xf32>
      %42 = vector.multi_reduction <add>, %39, %cst_31 [2] : vector<4x8x8xf32> to vector<4x8xf32>
      %43 = vector.shape_cast %42 : vector<4x8xf32> to vector<4x8x1xf32>
      %44 = arith.addf %41, %43 : vector<4x8x1xf32>
      %c0_32 = arith.constant 0 : index
      %c0_33 = arith.constant 0 : index
      %c0_34 = arith.constant 0 : index
      %45 = vector.load %arg10[%c0_32, %c0_33, %c0_34] : memref<4x8x1xf32, #tpu.memory_space<vmem>>, vector<4x8x1xf32>
      tpu.vector_store %arg10[%c0_32, %c0_33, %c0_34], %44 {strides = array<i32>} : memref<4x8x1xf32, #tpu.memory_space<vmem>>, vector<4x8x1xf32>,
      %c0_35 = arith.constant 0 : index
      %c0_36 = arith.constant 0 : index
      %c0_37 = arith.constant 0 : index
      %46 = vector.load %arg11[%c0_35, %c0_36, %c0_37] : memref<4x8x8xf32, #tpu.memory_space<vmem>>, vector<4x8x8xf32>
      %47 = vector.broadcast %36 : vector<4x8x1xf32> to vector<4x8x8xf32>
      %48 = arith.mulf %47, %46 : vector<4x8x8xf32>
      %49 = arith.truncf %39 : vector<4x8x8xf32> to vector<4x8x8xbf16>
      %cst_38 = arith.constant dense<0.000000e+00> : vector<4x8x8xf32>
      %50 = tpu.matmul %49, %29, %cst_38 {dimension_numbers = #tpu.dot_dimension_numbers<[2], [1], [1], [2], [0, 0, 0, 1, 1, 2], [0], [0]>} : vector<4x8x8xbf16>, vector<4x8x8xbf16>, vector<4x8x8xf32> -> vector<4x8x8xf32>
      %51 = arith.addf %48, %50 : vector<4x8x8xf32>
      %c0_39 = arith.constant 0 : index
      %c0_40 = arith.constant 0 : index
      %c0_41 = arith.constant 0 : index
      %52 = vector.load %arg11[%c0_39, %c0_40, %c0_41] : memref<4x8x8xf32, #tpu.memory_space<vmem>>, vector<4x8x8xf32>
      tpu.vector_store %arg11[%c0_39, %c0_40, %c0_41], %51 {strides = array<i32>} : memref<4x8x8xf32, #tpu.memory_space<vmem>>, vector<4x8x8xf32>,
      %c0_42 = arith.constant 0 : index
      %c0_43 = arith.constant 0 : index
      %c0_44 = arith.constant 0 : index
      %53 = vector.load %arg9[%c0_42, %c0_43, %c0_44] : memref<4x8x1xf32, #tpu.memory_space<vmem>>, vector<4x8x1xf32>
      tpu.vector_store %arg9[%c0_42, %c0_43, %c0_44], %34 {strides = array<i32>} : memref<4x8x1xf32, #tpu.memory_space<vmem>>, vector<4x8x1xf32>,
    } else {
    }
    %15 = arith.extui %11 : i1 to i32
    %c0_i32_4 = arith.constant 0 : i32
    %16 = arith.cmpi ne, %15, %c0_i32_4 : i32
    scf.if %16 {
      %c0 = arith.constant 0 : index
      %c0_10 = arith.constant 0 : index
      %c0_11 = arith.constant 0 : index
      %c0_12 = arith.constant 0 : index
      %c0_13 = arith.constant 0 : index
      %24 = vector.load %arg5[%c0, %c0_10, %c0_11, %c0_12, %c0_13] : memref<1x1x4x8x8xbf16, #tpu.memory_space<vmem>>, vector<1x1x4x8x8xbf16>
      %25 = vector.shape_cast %24 : vector<1x1x4x8x8xbf16> to vector<4x8x8xbf16>
      %c0_14 = arith.constant 0 : index
      %c0_15 = arith.constant 0 : index
      %c0_16 = arith.constant 0 : index
      %c0_17 = arith.constant 0 : index
      %c0_18 = arith.constant 0 : index
      %26 = vector.load %arg6[%c0_14, %c0_15, %c0_16, %c0_17, %c0_18] : memref<1x1x4x8x8xbf16, #tpu.memory_space<vmem>>, vector<1x1x4x8x8xbf16>
      %27 = vector.shape_cast %26 : vector<1x1x4x8x8xbf16> to vector<4x8x8xbf16>
      %c0_19 = arith.constant 0 : index
      %c0_20 = arith.constant 0 : index
      %c0_21 = arith.constant 0 : index
      %c0_22 = arith.constant 0 : index
      %c0_23 = arith.constant 0 : index
      %28 = vector.load %arg7[%c0_19, %c0_20, %c0_21, %c0_22, %c0_23] : memref<1x1x4x8x8xbf16, #tpu.memory_space<vmem>>, vector<1x1x4x8x8xbf16>
      %29 = vector.shape_cast %28 : vector<1x1x4x8x8xbf16> to vector<4x8x8xbf16>
      %cst = arith.constant dense<0.000000e+00> : vector<4x8x8xf32>
      %30 = tpu.matmul %25, %27, %cst {dimension_numbers = #tpu.dot_dimension_numbers<[2], [2], [1], [1], [0, 0, 0, 1, 1, 1], [0], [0]>} : vector<4x8x8xbf16>, vector<4x8x8xbf16>, vector<4x8x8xf32> -> vector<4x8x8xf32>
      %c8_i32_24 = arith.constant 8 : i32
      %31 = arith.muli %1, %c8_i32_24 : i32
      %32 = tpu.iota {dimensions = array<i32: 1>} : vector<4x8x8xi32>
      %33 = vector.broadcast %31 : i32 to vector<4x8x8xi32>
      %34 = arith.addi %33, %32 : vector<4x8x8xi32>
      %c8_i32_25 = arith.constant 8 : i32
      %35 = arith.muli %3, %c8_i32_25 : i32
      %36 = tpu.iota {dimensions = array<i32: 2>} : vector<4x8x8xi32>
      %37 = vector.broadcast %35 : i32 to vector<4x8x8xi32>
      %38 = arith.addi %37, %36 : vector<4x8x8xi32>
      %39 = arith.cmpi sle, %38, %34 : vector<4x8x8xi32>
      %cst_26 = arith.constant -1.000000e+30 : f32
      %40 = vector.broadcast %cst_26 : f32 to vector<4x8x8xf32>
      %41 = arith.select %39, %30, %40 : vector<4x8x8xi1>, vector<4x8x8xf32>
      %c0_27 = arith.constant 0 : index
      %c0_28 = arith.constant 0 : index
      %c0_29 = arith.constant 0 : index
      %42 = vector.load %arg9[%c0_27, %c0_28, %c0_29] : memref<4x8x1xf32, #tpu.memory_space<vmem>>, vector<4x8x1xf32>
      %cst_30 = arith.constant dense<0xFF800000> : vector<4x8xf32>
      %43 = vector.multi_reduction <maximumf>, %41, %cst_30 [2] : vector<4x8x8xf32> to vector<4x8xf32>
      %44 = vector.shape_cast %43 : vector<4x8xf32> to vector<4x8x1xf32>
      %45 = arith.maximumf %42, %44 : vector<4x8x1xf32>
      %46 = arith.subf %42, %45 : vector<4x8x1xf32>
      %47 = math.exp %46 : vector<4x8x1xf32>
      %48 = vector.broadcast %45 : vector<4x8x1xf32> to vector<4x8x8xf32>
      %49 = arith.subf %41, %48 : vector<4x8x8xf32>
      %50 = math.exp %49 : vector<4x8x8xf32>
      %c0_31 = arith.constant 0 : index
      %c0_32 = arith.constant 0 : index
      %c0_33 = arith.constant 0 : index
      %51 = vector.load %arg10[%c0_31, %c0_32, %c0_33] : memref<4x8x1xf32, #tpu.memory_space<vmem>>, vector<4x8x1xf32>
      %52 = arith.mulf %47, %51 : vector<4x8x1xf32>
      %cst_34 = arith.constant dense<0.000000e+00> : vector<4x8xf32>
      %53 = vector.multi_reduction <add>, %50, %cst_34 [2] : vector<4x8x8xf32> to vector<4x8xf32>
      %54 = vector.shape_cast %53 : vector<4x8xf32> to vector<4x8x1xf32>
      %55 = arith.addf %52, %54 : vector<4x8x1xf32>
      %c0_35 = arith.constant 0 : index
      %c0_36 = arith.constant 0 : index
      %c0_37 = arith.constant 0 : index
      %56 = vector.load %arg10[%c0_35, %c0_36, %c0_37] : memref<4x8x1xf32, #tpu.memory_space<vmem>>, vector<4x8x1xf32>
      tpu.vector_store %arg10[%c0_35, %c0_36, %c0_37], %55 {strides = array<i32>} : memref<4x8x1xf32, #tpu.memory_space<vmem>>, vector<4x8x1xf32>,
      %c0_38 = arith.constant 0 : index
      %c0_39 = arith.constant 0 : index
      %c0_40 = arith.constant 0 : index
      %57 = vector.load %arg11[%c0_38, %c0_39, %c0_40] : memref<4x8x8xf32, #tpu.memory_space<vmem>>, vector<4x8x8xf32>
      %58 = vector.broadcast %47 : vector<4x8x1xf32> to vector<4x8x8xf32>
      %59 = arith.mulf %58, %57 : vector<4x8x8xf32>
      %60 = arith.truncf %50 : vector<4x8x8xf32> to vector<4x8x8xbf16>
      %cst_41 = arith.constant dense<0.000000e+00> : vector<4x8x8xf32>
      %61 = tpu.matmul %60, %29, %cst_41 {dimension_numbers = #tpu.dot_dimension_numbers<[2], [1], [1], [2], [0, 0, 0, 1, 1, 2], [0], [0]>} : vector<4x8x8xbf16>, vector<4x8x8xbf16>, vector<4x8x8xf32> -> vector<4x8x8xf32>
      %62 = arith.addf %59, %61 : vector<4x8x8xf32>
      %c0_42 = arith.constant 0 : index
      %c0_43 = arith.constant 0 : index
      %c0_44 = arith.constant 0 : index
      %63 = vector.load %arg11[%c0_42, %c0_43, %c0_44] : memref<4x8x8xf32, #tpu.memory_space<vmem>>, vector<4x8x8xf32>
      tpu.vector_store %arg11[%c0_42, %c0_43, %c0_44], %62 {strides = array<i32>} : memref<4x8x8xf32, #tpu.memory_space<vmem>>, vector<4x8x8xf32>,
      %c0_45 = arith.constant 0 : index
      %c0_46 = arith.constant 0 : index
      %c0_47 = arith.constant 0 : index
      %64 = vector.load %arg9[%c0_45, %c0_46, %c0_47] : memref<4x8x1xf32, #tpu.memory_space<vmem>>, vector<4x8x1xf32>
      tpu.vector_store %arg9[%c0_45, %c0_46, %c0_47], %45 {strides = array<i32>} : memref<4x8x1xf32, #tpu.memory_space<vmem>>, vector<4x8x1xf32>,
    } else {
    }
    %c1_i32_5 = arith.constant 1 : i32
    %17 = arith.addi %3, %c1_i32_5 : i32
    %c8_i32_6 = arith.constant 8 : i32
    %18 = arith.muli %17, %c8_i32_6 : i32
    %c1_i32_7 = arith.constant 1 : i32
    %19 = arith.addi %1, %c1_i32_7 : i32
    %c8_i32_8 = arith.constant 8 : i32
    %20 = arith.muli %19, %c8_i32_8 : i32
    %21 = arith.cmpi sge, %18, %20 : i32
    %22 = arith.extui %21 : i1 to i32
    %c0_i32_9 = arith.constant 0 : i32
    %23 = arith.cmpi ne, %22, %c0_i32_9 : i32
    scf.if %23 {
      %c0 = arith.constant 0 : index
      %c0_10 = arith.constant 0 : index
      %c0_11 = arith.constant 0 : index
      %24 = vector.load %arg10[%c0, %c0_10, %c0_11] : memref<4x8x1xf32, #tpu.memory_space<vmem>>, vector<4x8x1xf32>
      %25 = tpu.reciprocal %24 {approx = true} : vector<4x8x1xf32> -> vector<4x8x1xf32>
      %c0_12 = arith.constant 0 : index
      %c0_13 = arith.constant 0 : index
      %c0_14 = arith.constant 0 : index
      %26 = vector.load %arg11[%c0_12, %c0_13, %c0_14] : memref<4x8x8xf32, #tpu.memory_space<vmem>>, vector<4x8x8xf32>
      %27 = vector.broadcast %25 : vector<4x8x1xf32> to vector<4x8x8xf32>
      %28 = arith.mulf %26, %27 : vector<4x8x8xf32>
      %29 = arith.truncf %28 : vector<4x8x8xf32> to vector<4x8x8xbf16>
      %30 = vector.extract_strided_slice %29 {offsets = [0, 0, 0], sizes = [1, 8, 8], strides = [1, 1, 1]} : vector<4x8x8xbf16> to vector<1x8x8xbf16>
      %31 = vector.shape_cast %30 : vector<1x8x8xbf16> to vector<8x8xbf16>
      %32 = vector.extract_strided_slice %29 {offsets = [1, 0, 0], sizes = [1, 8, 8], strides = [1, 1, 1]} : vector<4x8x8xbf16> to vector<1x8x8xbf16>
      %33 = vector.shape_cast %32 : vector<1x8x8xbf16> to vector<8x8xbf16>
      %34 = vector.extract_strided_slice %29 {offsets = [2, 0, 0], sizes = [1, 8, 8], strides = [1, 1, 1]} : vector<4x8x8xbf16> to vector<1x8x8xbf16>
      %35 = vector.shape_cast %34 : vector<1x8x8xbf16> to vector<8x8xbf16>
      %36 = vector.extract_strided_slice %29 {offsets = [3, 0, 0], sizes = [1, 8, 8], strides = [1, 1, 1]} : vector<4x8x8xbf16> to vector<1x8x8xbf16>
      %37 = vector.shape_cast %36 : vector<1x8x8xbf16> to vector<8x8xbf16>
      %38 = tpu.concatenate %31, %33, %35, %37 in 1 : vector<8x8xbf16>, vector<8x8xbf16>, vector<8x8xbf16>, vector<8x8xbf16> -> vector<8x32xbf16>
      %c0_15 = arith.constant 0 : index
      %c0_16 = arith.constant 0 : index
      %c0_17 = arith.constant 0 : index
      %39 = vector.load %arg8[%c0_15, %c0_16, %c0_17] : memref<1x8x32xbf16, #tpu.memory_space<vmem>>, vector<1x8x32xbf16>
      %40 = vector.shape_cast %39 : vector<1x8x32xbf16> to vector<8x32xbf16>
      %41 = vector.shape_cast %38 : vector<8x32xbf16> to vector<1x8x32xbf16>
      tpu.vector_store %arg8[%c0_15, %c0_16, %c0_17], %41 {strides = array<i32>} : memref<1x8x32xbf16, #tpu.memory_space<vmem>>, vector<1x8x32xbf16>,
    } else {
    }
    return
  }
  func.func @transform_0(%arg0: i32, %arg1: i32, %arg2: i32, %arg3: memref<1xi32, #tpu.memory_space<smem>>, %arg4: memref<1xi32, #tpu.memory_space<smem>>) -> (i32, i32, i32, i32, i32) {
    %0 = arith.index_cast %arg2 : i32 to index
    %1 = memref.load %arg3[%0] : memref<1xi32, #tpu.memory_space<smem>>
    %c0_i32 = arith.constant 0 : i32
    %c0_i32_0 = arith.constant 0 : i32
    %c0_i32_1 = arith.constant 0 : i32
    return %arg0, %c0_i32, %arg1, %1, %c0_i32_0 : i32, i32, i32, i32, i32
  }
  func.func @transform_1(%arg0: i32, %arg1: i32, %arg2: i32, %arg3: memref<1xi32, #tpu.memory_space<smem>>, %arg4: memref<1xi32, #tpu.memory_space<smem>>) -> (i32, i32, i32, i32, i32) {
    %0 = arith.index_cast %arg2 : i32 to index
    %1 = memref.load %arg4[%0] : memref<1xi32, #tpu.memory_space<smem>>
    %c1_i32 = arith.constant 1 : i32
    %c0_i32 = arith.constant 0 : i32
    %c0_i32_0 = arith.constant 0 : i32
    return %arg0, %c1_i32, %arg1, %1, %c0_i32 : i32, i32, i32, i32, i32
  }
  func.func @transform_2(%arg0: i32, %arg1: i32, %arg2: i32, %arg3: memref<1xi32, #tpu.memory_space<smem>>, %arg4: memref<1xi32, #tpu.memory_space<smem>>) -> (i32, i32, i32, i32, i32) {
    %0 = arith.index_cast %arg2 : i32 to index
    %1 = memref.load %arg4[%0] : memref<1xi32, #tpu.memory_space<smem>>
    %c2_i32 = arith.constant 2 : i32
    %c0_i32 = arith.constant 0 : i32
    %c0_i32_0 = arith.constant 0 : i32
    return %arg0, %c2_i32, %arg1, %1, %c0_i32 : i32, i32, i32, i32, i32
  }
  func.func @transform_3(%arg0: i32, %arg1: i32, %arg2: i32, %arg3: memref<1xi32, #tpu.memory_space<smem>>, %arg4: memref<1xi32, #tpu.memory_space<smem>>) -> (i32, i32, i32) {
    %0 = arith.index_cast %arg2 : i32 to index
    %1 = memref.load %arg3[%0] : memref<1xi32, #tpu.memory_space<smem>>
    %c0_i32 = arith.constant 0 : i32
    return %arg0, %1, %arg1 : i32, i32, i32
  }
}

</mosaic_0001>

<bundles_post_ra>
// kernel: _lambda_.3
= control target key start
LH: loop header
LB: loop body
LE: loop exit
PB: predicated region body
PF: predicated region fallthrough
CT: control target
= control target key end

     0   :  { %vm61_vm0 = vcmask 261120   ;;  %v183_v0 = vmov 0.0   ;;  %vm184_vm1 = vmmov 0   ;;  %vm132_vm2 = vcmask 781312   ;;  %s234_s1 = inlined_call_operand.vmem [shape: bf16[96,32], index: 1, kind: input, shape index: {}]   ;;  %s235_s0 = inlined_call_operand.vmem [shape: bf16[16,32], index: 0, kind: input, shape index: {}]   ;;  %s236_s2 = inlined_call_operand.vmem [shape: bf16[16,96], index: 2, kind: output, shape index: {}]  }
   0x1   :  { %158 = vmatprep.subr.bf16.mxu0 %v183_v0  ;;  %v176_v1 = vld [vmem:[%s234_s1] sm:$0xff]   ;;  %170 = vmatprep.mubr.msk.bf16.mxu0 %vm184_vm1, %v183_v0  ;;  %v177_v3 = vld [vmem:[%s234_s1 + $0x8] sm:$0xff]   ;;  %v178_v5 = vld [vmem:[%s234_s1 + $0x10] sm:$0xff]  }
   0x2   :  { %v66_v2 = vsel %vm61_vm0, %v176_v1, 0  ;;  %v69_v4 = vsel %vm61_vm0, %v177_v3, 0  ;;  %v72_v6 = vsel %vm61_vm0, %v178_v5, 0  ;;  %v179_v7 = vld [vmem:[%s234_s1 + $0x18] sm:$0xff]   ;;  %v180_v9 = vld [vmem:[%s234_s1 + $0x20] sm:$0xff]   ;;  %v181_v11 = vld [vmem:[%s234_s1 + $0x28] sm:$0xff]  }
   0x3   :  { %159 = vmatpush3.bf16.xpose.msra.mxu0 %v66_v2  ;;  %v75_v8 = vsel %vm61_vm0, %v179_v7, 0  ;;  %v78_v10 = vsel %vm61_vm0, %v180_v9, 0  ;;  %v81_v12 = vsel %vm61_vm0, %v181_v11, 0  ;;  %v182_v13 = vld [vmem:[%s235_s0] sm:$0xff]  }
   0x4   :  { %160 = vmatprep.subr.bf16.mxu0 %v183_v0 }
   0xb   :  { %161 = vmatpush3.bf16.xpose.msra.mxu0 %v69_v4 }
   0xc   :  { %162 = vmatprep.subr.bf16.mxu0 %v183_v0 }
  0x13   :  { %163 = vmatpush3.bf16.xpose.msra.mxu0 %v72_v6 }
  0x14   :  { %164 = vmatprep.subr.bf16.mxu0 %v183_v0 }
  0x1b   :  { %165 = vmatpush3.bf16.xpose.msra.mxu0 %v75_v8 }
  0x1c   :  { %166 = vmatprep.subr.bf16.mxu0 %v183_v0 }
  0x23   :  { %167 = vmatpush3.bf16.xpose.msra.mxu0 %v78_v10 }
  0x24   :  { %168 = vmatprep.subr.bf16.mxu0 %v183_v0 }
  0x2b   :  { %169 = vmatpush3.bf16.xpose.msra.mxu0 %v81_v12 }
  0x32   :  { %171 = vmatmul.mubr.msk.bf16.vlgmr.msra.gmra.mrb[0].mxu0 %vm61_vm0, %v182_v13 }
 0x105   :  { %v117_v14 = vpop.f32.mrb[0].mxu0 }
 0x106   :  { %v149_v15 = vpack.c.bf16 %v117_v14, %v117_v14  ;;  %v172_v16 = vpop.f32.mrb[1].mxu0 }
 0x107   :  { %v120_v17 = vpop.f32.mrb[2].mxu0 }
 0x108   :  { %133 = vst.msk [vmem:[%s236_s2] sm:$0xf] %vm132_vm2, %v149_v15  ;;  %v150_v18 = vpack.c.bf16 %v120_v17, %v120_v17  ;;  %v173_v19 = vpop.f32.mrb[3].mxu0 }
 0x10a   :  { %134 = vst.msk [vmem:[%s236_s2 + $0x4] sm:$0xf] %vm132_vm2, %v150_v18 }

// kernel: _lambda_.5
= control target key start
LH: loop header
LB: loop body
LE: loop exit
PB: predicated region body
PF: predicated region fallthrough
CT: control target
= control target key end

     0   :  { %v150_v1 = vmov 0.0   ;;  %vm34_vm0 = vcmask 261120   ;;  %vm151_vm1 = vmmov 0   ;;  %s196_s0 = inlined_call_operand.vmem [shape: bf16[16,32], index: 0, kind: input, shape index: {}]   ;;  %s197_s1 = inlined_call_operand.vmem [shape: bf16[32,32], index: 1, kind: input, shape index: {}]   ;;  %s198_s2 = inlined_call_operand.hbm [shape: f32[16,32], index: 2, kind: output, shape index: {}]  }
   0x1   :  { %v123_v0 = vld [vmem:[%s197_s1] sm:$0xff]   ;;  %110 = vmatprep.subr.bf16.mxu0 %v150_v1  ;;  %114 = vmatprep.mubr.msk.bf16.mxu0 %vm151_vm1, %v150_v1 }
   0x2   :  { %v39_v2 = vsel %vm34_vm0, %v123_v0, 0 }
   0x3   :  { %111 = vmatpush3.bf16.xpose.msra.mxu0 %v39_v2 }
   0x4   :  { %7 = vsyncpa [#allocation3], 0  ;;  %112 = vmatprep.subr.bf16.mxu0 %v150_v1  ;;  %v124_v3 = vld [vmem:[%s197_s1 + $0x8] sm:$0xff]   ;;  %v125_v5 = vld [vmem:[%s196_s0] sm:$0xff]   ;;  %s152_s15 = smov [#allocation2]  }
   0x5   :  { %v42_v4 = vsel %vm34_vm0, %v124_v3, 0  ;;  %s92_s16 = sshll.u32 %s152_s15, 4  ;;  %s93_s16 = int_to_ptr.vmem [resolvable:$true] %s92_s16 }
   0x6   :  { %s126_s1 = scalar_lea.vmem %s93_s16, 256  ;;  %p131_p1 = scmp.lt.s32.totalorder %s93_s16, %s93_s16 }
   0x7   :  { %p127_p0 = scmp.ne.s32.totalorder %s93_s16, %s126_s1  ;;  %p132_p2 = scmp.lt.s32.totalorder %s126_s1, %s126_s1 }
   0x9   :  { %p133_p3 = por %p132_p2, %p131_p1 }
   0xb   :  { %113 = vmatpush3.bf16.xpose.msra.mxu0 %v42_v4  ;;  %p134_p4 = pnand %p133_p3, %p127_p0 }
  0x12   :  { %115 = vmatmul.mubr.msk.bf16.vlgmr.msra.gmra.mrb[0].mxu0 %vm34_vm0, %v125_v5 }
  0xe5   :  { %v78_v6 = vpop.f32.mrb[0].mxu0 }
  0xe6   :  { %85 = vst.msk [vmem:[#allocation2] sm:$0xff] %vm34_vm0, %v78_v6  ;;  %v116_v7 = vpop.f32.mrb[1].mxu0 }
  0xe7   :  { %v81_v8 = vpop.f32.mrb[2].mxu0 }
  0xe8   :  { %86 = vst.msk [vmem:[#allocation2 + $0x8] sm:$0xff] %vm34_vm0, %v81_v8  ;;  %v117_v9 = vpop.f32.mrb[3].mxu0 }
  0xe9   :  { %137 = shalt.err (!%p134_p4)
}
  0xea   :  { %s138_s18 = scalar_lea.hbm %s198_s2, 256 }
  0xeb   :  { %p139_p5 = scmp.ne.s32.totalorder %s198_s2, %s138_s18  ;;  %p142_p6 = scmp.lt.u32.totalorder %s138_s18, %s198_s2 }
  0xed   :  { %p144_p7 = pnand %p142_p6, %p139_p5 }
  0xef   :  { %147 = shalt.err (!%p144_p7)
}
  0xf0   :  { %s153_s23 = smov 128   ;;  %s154_s24 = smov 8  }
  0xf1   :  { %98 = dma.vmem_to_hbm [thread:$0]  %s93_s16, 256, %s198_s2, [#allocation3], %s153_s23, %s153_s23, %s154_s24  }
  0xf2   :  { %148 = dma.done.wait [#allocation3], 256  }
  0xf3   :  { %149 = vsyncadd [#allocation3], 4294967040 }
  0xf4   :  { %102 = vsyncpa [#allocation3], 1 }

// kernel: _lambda_.4
= control target key start
LH: loop header
LB: loop body
LE: loop exit
PB: predicated region body
PF: predicated region fallthrough
CT: control target
= control target key end

     0   :  { %s1998_s22 = smov 0   ;;  %s2000_s23 = smov 0   ;;  %s2316_s0 = inlined_call_operand.<no memory space> [shape: s32[1], index: 0, kind: input, shape index: {}, may-alias: {0,1}]   ;;  %s2317_s1 = inlined_call_operand.<no memory space> [shape: s32[1], index: 1, kind: input, shape index: {}, may-alias: {0,1}]   ;;  %s2318_s2 = inlined_call_operand.vmem [shape: bf16[2,3,4,8,8], index: 2, kind: input, shape index: {}, may-alias: {2,3,4}]   ;;  %s2319_s3 = inlined_call_operand.vmem [shape: bf16[2,3,4,8,8], index: 3, kind: input, shape index: {}, may-alias: {2,3,4}]   ;;  %s2320_s4 = inlined_call_operand.vmem [shape: bf16[2,3,4,8,8], index: 4, kind: input, shape index: {}, may-alias: {2,3,4}]   ;;  %s2321_s5 = inlined_call_operand.vmem [shape: bf16[2,8,32], index: 5, kind: output, shape index: {}]  }
   0x1   :  { %10 = sst [smem:[#allocation6]] %s2316_s0  ;;  %s2002_s24 = smov 0  }
   0x2   :  { %11 = sst [smem:[#allocation7]] %s2317_s1 }
   0x3 LB: > { %s36_s0 = sadd.s32 1, %s1944_s23  ;;  %p1663_p0 = scmp.ge.s32.totalorder %s1948_s24, 1  ;;  %s1948_s24 = sphi %s2002_s24, %s17_s24   ;;  %s1944_s23 = sphi %s2000_s23, %s2323_s23   ;;  %s1940_s22 = sphi %s1998_s22, %s2322_s22  }
   0x4   : > { %p38_p1 = scmp.ge.s32.totalorder %s36_s0, 2  ;;  %p236_p2 = scmp.lt.s32.totalorder %s1948_s24, 3 }
   0x6   : > { %s2325_s0 = smov (%p38_p1, %s36_s0), 0  ;;  %p237_p3 = pnand %p1663_p0, %p236_p2 }
   0x7   : > { %s2016_s1 = sld [smem:[#allocation6]] (!%p237_p3)  ;;  %p304_p4 = scmp.lt.s32.totalorder (!%p237_p3), %s1940_s22, 1 }
   0x8   : > { %240 = sbr.rel (%p237_p3) target bundleno = 1780 (0x6f4), region = 32  ;;  %s2018_s25 = sld [smem:[#allocation7]] (!%p237_p3) }
   0xd   : > { %p308_p5 = scmp.lt.s32.totalorder (!%p237_p3), %s2016_s1, 0 }
   0xe   : > { %p323_p6 = scmp.lt.s32.totalorder (!%p237_p3), %s2018_s25, 0  ;;  %p1668_p7 = scmp.ne.s32.totalorder (!%p237_p3), %s2018_s25, 0 }
   0xf   : > { %s2327_s22 = smov (!%p304_p4, %s1940_s22), 1  ;;  %vm368_vm0 = vcmask (!%p1668_p7), 7168   ;;  %vm377_vm1 = vcmask (!%p1668_p7), 64512   ;;  %v1950_v0 = vmov (!%p1668_p7), -1e+30   ;;  %v1951_v1 = vmov (!%p1668_p7), 0.0  }
  0x10   : > { %s1843_s26 = smul.u32 12, %s2327_s22  ;;  %369 = vst.msk [vmem:[#allocation2] sm:$0xff] (!%p1668_p7), %vm368_vm0, %v1950_v0  ;;  %370 = vst.msk [vmem:[#allocation2 + $0x8] sm:$0xff] (!%p1668_p7), %vm368_vm0, %v1950_v0 }
  0x11   : > { %s309_s27 = scalar_select %p308_p5, %s2016_s1, 0 }
  0x12   : > { %s324_s28 = scalar_select %p323_p6, %s2018_s25, 0 }
  0x13   : > { %s312_s29 = sadd.s32 %s1843_s26, %s309_s27  ;;  %s357_s30 = sadd.s32 %s309_s27, %s2327_s22  ;;  %371 = vst.msk [vmem:[#allocation2 + $0x10] sm:$0xff] (!%p1668_p7), %vm368_vm0, %v1950_v0  ;;  %372 = vst.msk [vmem:[#allocation2 + $0x18] sm:$0xff] (!%p1668_p7), %vm368_vm0, %v1950_v0 }
  0x14   : > { %s1664_s6 = sshll.u32 %s312_s29, 2  ;;  %s1593_s7 = sadd.s32 %s1843_s26, %s324_s28  ;;  %373 = vst.msk [vmem:[#allocation3] sm:$0xff] (!%p1668_p7), %vm368_vm0, %v1951_v1  ;;  %374 = vst.msk [vmem:[#allocation3 + $0x8] sm:$0xff] (!%p1668_p7), %vm368_vm0, %v1951_v1 }
  0x15   : > { %s2027_s10 = scalar_lea.vmem %s2318_s2, %s1664_s6  ;;  %s1665_s11 = sshll.u32 %s1593_s7, 2  ;;  %375 = vst.msk [vmem:[#allocation3 + $0x10] sm:$0xff] (!%p1668_p7), %vm368_vm0, %v1951_v1  ;;  %376 = vst.msk [vmem:[#allocation3 + $0x18] sm:$0xff] (!%p1668_p7), %vm368_vm0, %v1951_v1 }
  0x16   : > { %s2032_s14 = scalar_lea.vmem %s2319_s3, %s1665_s11  ;;  %s2037_s17 = scalar_lea.vmem %s2320_s4, %s1665_s11  ;;  %378 = vst.msk [vmem:[#allocation4] sm:$0xff] (!%p1668_p7), %vm377_vm1, %v1951_v1  ;;  %379 = vst.msk [vmem:[#allocation4 + $0x8] sm:$0xff] (!%p1668_p7), %vm377_vm1, %v1951_v1 }
  0x17   : > { %s2039_s18 = sshll.u32 %s357_s30, 2  ;;  %367 = sbr.rel (%p1668_p7) target bundleno = 30 (0x1e), region = 36  ;;  %380 = vst.msk [vmem:[#allocation4 + $0x10] sm:$0xff] (!%p1668_p7), %vm377_vm1, %v1951_v1  ;;  %381 = vst.msk [vmem:[#allocation4 + $0x18] sm:$0xff] (!%p1668_p7), %vm377_vm1, %v1951_v1 }
  0x18   : > { %s359_s21 = scalar_lea.vmem %s2321_s5, %s2039_s18 }
  0x1e PF: > { %s1711_s22 = sshll.u32 %s2018_s25, 3  ;;  %s2048_s26 = sshll.u32 %s2016_s1, 3 }
  0x1f   : > { %s2052_s27 = sadd.s32 8, %s1711_s22 }
  0x20   : > { %s1670_s28 = sadd.s32 4294967295, %s2052_s27 }
  0x21   : > { %p1672_p8 = scmp.gt.s32.totalorder %s1670_s28, %s2048_s26 }
  0x22   : > { %v1673_v2 = vld [vmem:[%s2032_s14 + $0x10] sm:$0xf] (!%p1672_p8)  ;;  %vm403_vm2 = vcmask (!%p1672_p8), 64512   ;;  %v1674_v3 = vld [vmem:[%s2032_s14 + $0x14] sm:$0xf] (!%p1672_p8)  ;;  %v1952_v4 = vmov (!%p1672_p8), 0.0  }
  0x23   : > { %390 = sbr.rel (%p1672_p8) target bundleno = 772 (0x304), region = 40  ;;  %1747 = vmatprep.subr.bf16.mxu0 (!%p1672_p8), %v1952_v4  ;;  %v408_v5 = vsel (!%p1672_p8), %vm403_vm2, %v1673_v2, 0  ;;  %1753 = vmatprep.subr.bf16.mxu1 (!%p1672_p8), %v1952_v4  ;;  %v454_v6 = vsel (!%p1672_p8), %vm403_vm2, %v1674_v3, 0  ;;  %vm1953_vm3 = vmmov (!%p1672_p8), 0   ;;  %v1675_v7 = vld [vmem:[%s2032_s14 + $0x18] sm:$0xf] (!%p1672_p8) }
  0x24   : > { %1748 = vmatpush3.bf16.xpose.msra.mxu0 (!%p1672_p8), %v408_v5  ;;  %1754 = vmatpush3.bf16.xpose.msra.mxu1 (!%p1672_p8), %v454_v6  ;;  %v1676_v8 = vld [vmem:[%s2032_s14 + $0x1c] sm:$0xf] (!%p1672_p8)  ;;  %v391_v9 = vld [vmem:[%s2027_s10] sm:$0xf] (!%p1672_p8)  ;;  %v392_v10 = vld [vmem:[%s2027_s10 + $0x4] sm:$0xf] (!%p1672_p8) }
  0x25   : > { %1749 = vmatprep.mubr.msk.bf16.mxu0 (!%p1672_p8), %vm1953_vm3, %v1952_v4  ;;  %1759 = vmatprep.subr.bf16.mxu0 (!%p1672_p8), %v1952_v4  ;;  %v500_v11 = vsel (!%p1672_p8), %vm403_vm2, %v1675_v7, 0  ;;  %v546_v12 = vsel (!%p1672_p8), %vm403_vm2, %v1676_v8, 0  ;;  %v393_v13 = vld [vmem:[%s2027_s10 + $0x8] sm:$0xf] (!%p1672_p8)  ;;  %v394_v14 = vld [vmem:[%s2027_s10 + $0xc] sm:$0xf] (!%p1672_p8) }
  0x26   : > { %1755 = vmatprep.mubr.msk.bf16.mxu1 (!%p1672_p8), %vm1953_vm3, %v1952_v4  ;;  %1765 = vmatprep.subr.bf16.mxu1 (!%p1672_p8), %v1952_v4  ;;  %v1954_v35 = vmov (!%p1672_p8), 0   ;;  %v588_v36 = vld [vmem:[#allocation2] sm:$0xff] (!%p1672_p8)  ;;  %vm676_vm4 = vcmask (!%p1672_p8), 7168   ;;  %v2108_v39 = vld [vmem:[#allocation2 + $0x8] sm:$0xff] (!%p1672_p8)  ;;  %v590_v44 = vld [vmem:[#allocation2 + $0x10] sm:$0xff] (!%p1672_p8)  ;;  %vm716_vm5 = vcmask (!%p1672_p8), 1043456  }
  0x27   : > { %1880 = vset.pattern.permute.xlu0 (!%p1672_p8), %v1954_v35  ;;  %1881 = vset.pattern.permute.xlu1 (!%p1672_p8), %v1954_v35  ;;  %v2119_v48 = vld [vmem:[#allocation2 + $0x18] sm:$0xff] (!%p1672_p8)  ;;  %v1677_v53 = vld [vmem:[%s2037_s17 + $0x20] sm:$0xf] (!%p1672_p8)  ;;  %v1678_v56 = vld [vmem:[%s2037_s17 + $0x24] sm:$0xf] (!%p1672_p8) }
  0x28   : > { %v718_v54 = vsel (!%p1672_p8), %vm716_vm5, %v1677_v53, 0  ;;  %v764_v57 = vsel (!%p1672_p8), %vm716_vm5, %v1678_v56, 0  ;;  %v1679_v6 = vld [vmem:[%s2037_s17 + $0x28] sm:$0xf] (!%p1672_p8)  ;;  %v683_v56 = vld [vmem:[#allocation4 + $0x10] sm:$0xff] (!%p1672_p8) }
  0x2b   : > { %1750 = vmatmul.mubr.msk.bf16.vlgmr.msra.gmra.mrb[0].mxu0 %vm403_vm2, %v391_v9  ;;  %1756 = vmatmul.mubr.msk.bf16.vlgmr.msra.gmra.mrb[0].mxu1 %vm403_vm2, %v392_v10 }
  0x2c   : > { %1760 = vmatpush3.bf16.xpose.msra.mxu0 %v500_v11  ;;  %1766 = vmatpush3.bf16.xpose.msra.mxu1 %v546_v12  ;;  %v810_v11 = vsel %vm716_vm5, %v1679_v6, 0  ;;  %v1680_v12 = vld [vmem:[%s2037_s17 + $0x2c] sm:$0xf] }
  0x2d   : > { %1761 = vmatprep.mubr.msk.bf16.mxu0 %vm1953_vm3, %v1952_v4  ;;  %1767 = vmatprep.mubr.msk.bf16.mxu1 %vm1953_vm3, %v1952_v4 }
  0x2e   : > { %1771 = vmatprep.subr.bf16.mxu0 %v1952_v4  ;;  %1777 = vmatprep.subr.bf16.mxu1 %v1952_v4 }
  0x33   : > { %1762 = vmatmul.mubr.msk.bf16.vlgmr.msra.gmra.mrb[4].mxu0 %vm403_vm2, %v393_v13  ;;  %1768 = vmatmul.mubr.msk.bf16.vlgmr.msra.gmra.mrb[4].mxu1 %vm403_vm2, %v394_v14 }
  0x34   : > { %1773 = vmatprep.mubr.msk.bf16.mxu0 %vm1953_vm3, %v1952_v4  ;;  %1779 = vmatprep.mubr.msk.bf16.mxu1 %vm1953_vm3, %v1952_v4 }
  0x35   : > { %1772 = vmatpush3.bf16.msra.mxu0 %v718_v54  ;;  %1778 = vmatpush3.bf16.msra.mxu1 %v764_v57 }
  0x36   : > { %1783 = vmatprep.subr.bf16.mxu0 %v1952_v4  ;;  %1789 = vmatprep.subr.bf16.mxu1 %v1952_v4 }
  0xfe   : > { %v2092_v15 = vpop.f32.mrb[0].mxu0  ;;  %v2094_v16 = vpop.f32.mrb[0].mxu1 }
  0xff   : > { %v1751_v17 = vpop.f32.mrb[1].mxu0  ;;  %v592_v18 = vsel %vm403_vm2, %v2092_v15, -inf  ;;  %v1757_v19 = vpop.f32.mrb[1].mxu1  ;;  %v595_v24 = vsel %vm403_vm2, %v2094_v16, -inf }
 0x100   : > { %593 = vmax.xlane.f32.xlu0 %v592_v18  ;;  %v447_v20 = vpop.f32.mrb[2].mxu0  ;;  %v493_v21 = vpop.f32.mrb[2].mxu1  ;;  %v856_v17 = vsel %vm716_vm5, %v1680_v12, 0 }
 0x101   : > { %v1752_v22 = vpop.f32.mrb[3].mxu0  ;;  %v1758_v23 = vpop.f32.mrb[3].mxu1 }
 0x104   : > { %596 = vmax.xlane.f32.xlu0 %v595_v24 }
 0x106   : > { %v2100_v25 = vpop.f32.mrb[4].mxu0  ;;  %v2102_v26 = vpop.f32.mrb[4].mxu1 }
 0x107   : > { %v1763_v27 = vpop.f32.mrb[5].mxu0  ;;  %v598_v28 = vsel %vm403_vm2, %v2100_v25, -inf  ;;  %v1769_v29 = vpop.f32.mrb[5].mxu1  ;;  %v601_v34 = vsel %vm403_vm2, %v2102_v26, -inf }
 0x108   : > { %599 = vmax.xlane.f32.xlu1 %v598_v28  ;;  %v539_v30 = vpop.f32.mrb[6].mxu0  ;;  %v585_v31 = vpop.f32.mrb[6].mxu1  ;;  %v652_v29 = vld [vmem:[#allocation3] sm:$0xff] }
 0x109   : > { %v1764_v32 = vpop.f32.mrb[7].mxu0  ;;  %v1770_v33 = vpop.f32.mrb[7].mxu1 }
 0x10a   : > { %v653_v32 = vld [vmem:[#allocation3 + $0x8] sm:$0xff] }
 0x10c   : > { %602 = vmax.xlane.f32.xlu1 %v601_v34 }
 0x18d   : > { %v594_v37 = vpop.xlane.xlu0 %593 }
 0x18e   : > { %v604_v38 = vmax.f32 %v588_v36, %v594_v37 }
 0x190   : > { %v608_v40 = vsub.f32 %v588_v36, %v604_v38  ;;  %906 = vst.msk [vmem:[#allocation2] sm:$0xff] %vm676_vm4, %v604_v38  ;;  %622 = vperm.xlu0 %1880, %v604_v38   ;;  %v654_v38 = vld [vmem:[#allocation3 + $0x10] sm:$0xff] }
 0x191   : > { %v597_v41 = vpop.xlane.xlu0 %596 }
 0x192   : > { %v612_v42 = vmul.f32 1.442695, %v608_v40  ;;  %v2112_v43 = vmax.f32 %v2108_v39, %v597_v41  ;;  %v655_v41 = vld [vmem:[#allocation3 + $0x18] sm:$0xff] }
 0x194   : > { %1882 = vpow2.f32 %v612_v42  ;;  %v609_v45 = vsub.f32 %v2108_v39, %v2112_v43  ;;  %907 = vst.msk [vmem:[#allocation2 + $0x8] sm:$0xff] %vm676_vm4, %v2112_v43  ;;  %627 = vperm.xlu1 %1881, %v2112_v43  }
 0x195   : > { %v600_v46 = vpop.xlane.xlu1 %599 }
 0x196   : > { %v606_v47 = vmax.f32 %v590_v44, %v600_v46  ;;  %v614_v21 = vmul.f32 1.442695, %v609_v45  ;;  %v681_v46 = vld [vmem:[#allocation4] sm:$0xff] }
 0x198   : > { %v610_v49 = vsub.f32 %v590_v44, %v606_v47  ;;  %908 = vst.msk [vmem:[#allocation2 + $0x10] sm:$0xff] %vm676_vm4, %v606_v47  ;;  %632 = vperm.xlu1 %1881, %v606_v47  }
 0x199   : > { %v603_v50 = vpop.xlane.xlu1 %602 }
 0x19a   : > { %v2123_v51 = vmax.f32 %v2119_v48, %v603_v50  ;;  %v616_v14 = vmul.f32 1.442695, %v610_v49 }
 0x19c   : > { %v611_v52 = vsub.f32 %v2119_v48, %v2123_v51  ;;  %909 = vst.msk [vmem:[#allocation2 + $0x18] sm:$0xff] %vm676_vm4, %v2123_v51  ;;  %637 = vperm.xlu1 %1881, %v2123_v51   ;;  %v682_v48 = vld [vmem:[#allocation4 + $0x8] sm:$0xff] }
 0x19e   : > { %v2132_v55 = vpop.eup %1882 }
 0x19f   : > { %v656_v30 = vmul.f32 %v2132_v55, %v652_v29 }
 0x1a0   : > { %687 = vperm.xlu1 %1881, %v2132_v55  }
 0x20f   : > { %v623_v58 = vpop.permute.xlu0 %622 }
 0x210   : > { %v640_v59 = vsub.f32 %v2092_v15, %v623_v58 }
 0x212   : > { %v644_v60 = vmul.f32 1.442695, %v640_v59 }
 0x213   : > { %v628_v61 = vpop.permute.xlu1 %627 }
 0x214   : > { %1884 = vpow2.f32 %v644_v60  ;;  %v641_v62 = vsub.f32 %v2094_v16, %v628_v61 }
 0x216   : > { %v646_v63 = vmul.f32 1.442695, %v641_v62 }
 0x217   : > { %v633_v0 = vpop.permute.xlu1 %632 }
 0x218   : > { %1886 = vpow2.f32 %v646_v63  ;;  %v642_v1 = vsub.f32 %v2100_v25, %v633_v0  ;;  %v684_v63 = vld [vmem:[#allocation4 + $0x18] sm:$0xff] }
 0x21a   : > { %v648_v2 = vmul.f32 1.442695, %v642_v1 }
 0x21b   : > { %v638_v3 = vpop.permute.xlu1 %637 }
 0x21c   : > { %1888 = vpow2.f32 %v648_v2  ;;  %v643_v5 = vsub.f32 %v2102_v26, %v638_v3  ;;  %v618_v26 = vmul.f32 1.442695, %v611_v52 }
 0x21e   : > { %v1885_v7 = vpop.eup %1884  ;;  %v650_v8 = vmul.f32 1.442695, %v643_v5 }
 0x21f   : > { %v660_v9 = vsel %vm403_vm2, %v1885_v7, 0.0  ;;  %v709_v10 = vpack.c.bf16 %v1885_v7, %v1885_v7  ;;  %v688_v28 = vpop.permute.xlu1 %687 }
 0x220   : > { %1890 = vpow2.f32 %v650_v8  ;;  %661 = vadd.xlane.f32.xlu1 %v660_v9  ;;  %v705_v47 = vmul.f32 %v688_v28, %v681_v46 }
 0x221   : > { %1774 = vmatmul.mubr.msk.bf16.vlgmr.msra.gmra.mrb[8].mxu0 %vm403_vm2, %v709_v10  ;;  %1892 = vpow2.f32 %v616_v14 }
 0x222   : > { %v1887_v13 = vpop.eup %1886  ;;  %1784 = vmatpush3.bf16.msra.mxu0 %v810_v11  ;;  %1785 = vmatprep.mubr.msk.bf16.mxu0 %vm1953_vm3, %v1952_v4  ;;  %1894 = vpow2.f32 %v614_v21 }
 0x223   : > { %v663_v15 = vsel %vm403_vm2, %v1887_v13, 0.0  ;;  %v710_v16 = vpack.c.bf16 %v1887_v13, %v1887_v13  ;;  %1896 = vpow2.f32 %v618_v26 }
 0x224   : > { %664 = vadd.xlane.f32.xlu0 %v663_v15 }
 0x225   : > { %1780 = vmatmul.mubr.msk.bf16.vlgmr.msra.gmra.mrb[8].mxu1 %vm403_vm2, %v710_v16 }
 0x226   : > { %v1889_v18 = vpop.eup %1888  ;;  %1790 = vmatpush3.bf16.msra.mxu1 %v856_v17  ;;  %1791 = vmatprep.mubr.msk.bf16.mxu1 %vm1953_vm3, %v1952_v4 }
 0x227   : > { %v711_v19 = vpack.c.bf16 %v1889_v18, %v1889_v18  ;;  %v666_v25 = vsel %vm403_vm2, %v1889_v18, 0.0 }
 0x229   : > { %1786 = vmatmul.mubr.msk.bf16.vlgmr.msra.gmra.mrb[12].mxu0 %vm403_vm2, %v711_v19 }
 0x22a   : > { %v1891_v20 = vpop.eup %1890 }
 0x22b   : > { %v712_v22 = vpack.c.bf16 %v1891_v20, %v1891_v20  ;;  %v1893_v23 = vpop.eup %1892  ;;  %v669_v4 = vsel %vm403_vm2, %v1891_v20, 0.0 }
 0x22c   : > { %v1895_v24 = vpop.eup %1894  ;;  %v658_v39 = vmul.f32 %v1893_v23, %v654_v38 }
 0x22d   : > { %1792 = vmatmul.mubr.msk.bf16.vlgmr.msra.gmra.mrb[12].mxu1 %vm403_vm2, %v712_v22  ;;  %v1897_v27 = vpop.eup %1896  ;;  %v657_v34 = vmul.f32 %v1895_v24, %v653_v32 }
 0x22e   : > { %v659_v43 = vmul.f32 %v1897_v27, %v655_v41 }
 0x231   : > { %697 = vperm.xlu1 %1881, %v1893_v23  }
 0x23a   : > { %692 = vperm.xlu0 %1880, %v1895_v24  }
 0x255   : > { %667 = vadd.xlane.f32.xlu1 %v666_v25 }
 0x259   : > { %670 = vadd.xlane.f32.xlu1 %v669_v4 }
 0x26a   : > { %702 = vperm.xlu1 %1881, %v1897_v27  }
 0x2ad   : > { %v662_v31 = vpop.xlane.xlu1 %661 }
 0x2ae   : > { %v672_v33 = vadd.f32 %v662_v31, %v656_v30 }
 0x2b0   : > { %677 = vst.msk [vmem:[#allocation3] sm:$0xff] %vm676_vm4, %v672_v33 }
 0x2b1   : > { %v665_v35 = vpop.xlane.xlu0 %664  ;;  %v698_v37 = vpop.permute.xlu1 %697 }
 0x2b2   : > { %v673_v36 = vadd.f32 %v665_v35, %v657_v34  ;;  %v707_v61 = vmul.f32 %v698_v37, %v683_v56 }
 0x2b4   : > { %678 = vst.msk [vmem:[#allocation3 + $0x8] sm:$0xff] %vm676_vm4, %v673_v36 }
 0x2b9   : > { %v693_v49 = vpop.permute.xlu0 %692 }
 0x2ba   : > { %v706_v54 = vmul.f32 %v693_v49, %v682_v48 }
 0x2e2   : > { %v668_v40 = vpop.xlane.xlu1 %667 }
 0x2e3   : > { %v674_v42 = vadd.f32 %v668_v40, %v658_v39 }
 0x2e5   : > { %679 = vst.msk [vmem:[#allocation3 + $0x10] sm:$0xff] %vm676_vm4, %v674_v42 }
 0x2e6   : > { %v671_v44 = vpop.xlane.xlu1 %670 }
 0x2e7   : > { %v675_v45 = vadd.f32 %v671_v44, %v659_v43 }
 0x2e9   : > { %680 = vst.msk [vmem:[#allocation3 + $0x18] sm:$0xff] %vm676_vm4, %v675_v45 }
 0x2ea   : > { %v703_v0 = vpop.permute.xlu1 %702 }
 0x2eb   : > { %v708_v6 = vmul.f32 %v703_v0, %v684_v63 }
 0x2f4   : > { %v754_v50 = vpop.f32.mrb[8].mxu0 }
 0x2f5   : > { %v898_v51 = vadd.f32 %v754_v50, %v705_v47  ;;  %v1775_v52 = vpop.f32.mrb[9].mxu0 }
 0x2f6   : > { %v757_v53 = vpop.f32.mrb[10].mxu0 }
 0x2f7   : > { %902 = vst.msk [vmem:[#allocation4] sm:$0xff] %vm403_vm2, %v898_v51  ;;  %v1776_v55 = vpop.f32.mrb[11].mxu0 }
 0x2f8   : > { %v800_v57 = vpop.f32.mrb[8].mxu1 }
 0x2f9   : > { %v899_v58 = vadd.f32 %v800_v57, %v706_v54  ;;  %v1781_v59 = vpop.f32.mrb[9].mxu1 }
 0x2fa   : > { %v803_v60 = vpop.f32.mrb[10].mxu1 }
 0x2fb   : > { %903 = vst.msk [vmem:[#allocation4 + $0x8] sm:$0xff] %vm403_vm2, %v899_v58  ;;  %v1782_v62 = vpop.f32.mrb[11].mxu1 }
 0x2fc   : > { %v846_v1 = vpop.f32.mrb[12].mxu0 }
 0x2fd   : > { %v900_v2 = vadd.f32 %v846_v1, %v707_v61  ;;  %v1787_v3 = vpop.f32.mrb[13].mxu0 }
 0x2fe   : > { %v849_v5 = vpop.f32.mrb[14].mxu0 }
 0x2ff   : > { %904 = vst.msk [vmem:[#allocation4 + $0x10] sm:$0xff] %vm403_vm2, %v900_v2  ;;  %v1788_v7 = vpop.f32.mrb[15].mxu0 }
 0x300   : > { %v892_v8 = vpop.f32.mrb[12].mxu1 }
 0x301   : > { %v901_v9 = vadd.f32 %v892_v8, %v708_v6  ;;  %v1793_v10 = vpop.f32.mrb[13].mxu1 }
 0x302   : > { %v895_v11 = vpop.f32.mrb[14].mxu1 }
 0x303   : > { %905 = vst.msk [vmem:[#allocation4 + $0x18] sm:$0xff] %vm403_vm2, %v901_v9  ;;  %v1794_v12 = vpop.f32.mrb[15].mxu1 }
 0x304 PF: > { %p1689_p9 = scmp.le.s32.totalorder %s1670_s28, %s2048_s26 }
 0x305   : > { %v1690_v13 = vld [vmem:[%s2032_s14 + $0x10] sm:$0xf] (!%p1689_p9)  ;;  %vm925_vm6 = vcmask (!%p1689_p9), 64512   ;;  %v1691_v14 = vld [vmem:[%s2032_s14 + $0x14] sm:$0xf] (!%p1689_p9)  ;;  %v1955_v15 = vmov (!%p1689_p9), 0.0   ;;  %v1110_v4 = vlaneseq (!%p1689_p9)  ;;  %v1112_v28 = vstv (!%p1689_p9), %s2048_s26 }
 0x306   : > { %912 = sbr.rel (%p1689_p9) target bundleno = 1512 (0x5e8), region = 44  ;;  %1795 = vmatprep.subr.bf16.mxu0 (!%p1689_p9), %v1955_v15  ;;  %v930_v16 = vsel (!%p1689_p9), %vm925_vm6, %v1690_v13, 0  ;;  %1801 = vmatprep.subr.bf16.mxu1 (!%p1689_p9), %v1955_v15  ;;  %v976_v17 = vsel (!%p1689_p9), %vm925_vm6, %v1691_v14, 0  ;;  %vm1956_vm7 = vmmov (!%p1689_p9), 0   ;;  %v1692_v18 = vld [vmem:[%s2032_s14 + $0x18] sm:$0xf] (!%p1689_p9)  ;;  %v1117_v29 = vstv (!%p1689_p9), %s1711_s22 }
 0x307   : > { %1796 = vmatpush3.bf16.xpose.msra.mxu0 (!%p1689_p9), %v930_v16  ;;  %1802 = vmatpush3.bf16.xpose.msra.mxu1 (!%p1689_p9), %v976_v17  ;;  %v1693_v19 = vld [vmem:[%s2032_s14 + $0x1c] sm:$0xf] (!%p1689_p9)  ;;  %v913_v20 = vld [vmem:[%s2027_s10] sm:$0xf] (!%p1689_p9)  ;;  %v914_v21 = vld [vmem:[%s2027_s10 + $0x4] sm:$0xf] (!%p1689_p9) }
 0x308   : > { %1797 = vmatprep.mubr.msk.bf16.mxu0 (!%p1689_p9), %vm1956_vm7, %v1955_v15  ;;  %1807 = vmatprep.subr.bf16.mxu0 (!%p1689_p9), %v1955_v15  ;;  %v1022_v22 = vsel (!%p1689_p9), %vm925_vm6, %v1692_v18, 0  ;;  %v1068_v23 = vsel (!%p1689_p9), %vm925_vm6, %v1693_v19, 0  ;;  %v915_v24 = vld [vmem:[%s2027_s10 + $0x8] sm:$0xf] (!%p1689_p9)  ;;  %v916_v25 = vld [vmem:[%s2027_s10 + $0xc] sm:$0xf] (!%p1689_p9) }
 0x309   : > { %1803 = vmatprep.mubr.msk.bf16.mxu1 (!%p1689_p9), %vm1956_vm7, %v1955_v15  ;;  %1813 = vmatprep.subr.bf16.mxu1 (!%p1689_p9), %v1955_v15  ;;  %v1111_v26 = vshrl.u32 (!%p1689_p9), %v1110_v4, 7  ;;  %v1116_v27 = vand.u32 (!%p1689_p9), 127, %v1110_v4  ;;  %v1957_v56 = vmov (!%p1689_p9), 0   ;;  %v1124_v57 = vld [vmem:[#allocation2] sm:$0xff] (!%p1689_p9)  ;;  %vm1212_vm9 = vcmask (!%p1689_p9), 7168   ;;  %v2234_v60 = vld [vmem:[#allocation2 + $0x8] sm:$0xff] (!%p1689_p9) }
 0x30a   : > { %1898 = vset.pattern.permute.xlu0 (!%p1689_p9), %v1957_v56  ;;  %1899 = vset.pattern.permute.xlu1 (!%p1689_p9), %v1957_v56  ;;  %v1126_v1 = vld [vmem:[#allocation2 + $0x10] sm:$0xff] (!%p1689_p9)  ;;  %v2245_v6 = vld [vmem:[#allocation2 + $0x18] sm:$0xff] (!%p1689_p9)  ;;  %v1694_v11 = vld [vmem:[%s2037_s17 + $0x20] sm:$0xf] (!%p1689_p9)  ;;  %vm1252_vm10 = vcmask (!%p1689_p9), 1043456  }
 0x30b   : > { %v1113_v30 = vadd.s32 (!%p1689_p9), %v1112_v28, %v1111_v26  ;;  %v1118_v31 = vadd.s32 (!%p1689_p9), %v1117_v29, %v1116_v27  ;;  %v1254_v12 = vsel (!%p1689_p9), %vm1252_vm10, %v1694_v11, 0  ;;  %v1695_v14 = vld [vmem:[%s2037_s17 + $0x24] sm:$0xf] (!%p1689_p9)  ;;  %v1696_v27 = vld [vmem:[%s2037_s17 + $0x28] sm:$0xf] (!%p1689_p9) }
 0x30c   : > { %v1300_v16 = vsel (!%p1689_p9), %vm1252_vm10, %v1695_v14, 0  ;;  %v1219_v14 = vld [vmem:[#allocation4 + $0x10] sm:$0xff] (!%p1689_p9) }
 0x30d   : > { %vm1119_vm8 = vcmp.le.s32.totalorder %v1118_v31, %v1113_v30 }
 0x30e   : > { %1798 = vmatmul.mubr.msk.bf16.vlgmr.msra.gmra.mrb[0].mxu0 %vm925_vm6, %v913_v20  ;;  %1804 = vmatmul.mubr.msk.bf16.vlgmr.msra.gmra.mrb[0].mxu1 %vm925_vm6, %v914_v21 }
 0x30f   : > { %1808 = vmatpush3.bf16.xpose.msra.mxu0 %v1022_v22  ;;  %1814 = vmatpush3.bf16.xpose.msra.mxu1 %v1068_v23 }
 0x310   : > { %1809 = vmatprep.mubr.msk.bf16.mxu0 %vm1956_vm7, %v1955_v15  ;;  %1815 = vmatprep.mubr.msk.bf16.mxu1 %vm1956_vm7, %v1955_v15 }
 0x311   : > { %1819 = vmatprep.subr.bf16.mxu0 %v1955_v15  ;;  %1825 = vmatprep.subr.bf16.mxu1 %v1955_v15 }
 0x316   : > { %1810 = vmatmul.mubr.msk.bf16.vlgmr.msra.gmra.mrb[4].mxu0 %vm925_vm6, %v915_v24  ;;  %1816 = vmatmul.mubr.msk.bf16.vlgmr.msra.gmra.mrb[4].mxu1 %vm925_vm6, %v916_v25 }
 0x317   : > { %1821 = vmatprep.mubr.msk.bf16.mxu0 %vm1956_vm7, %v1955_v15  ;;  %1827 = vmatprep.mubr.msk.bf16.mxu1 %vm1956_vm7, %v1955_v15 }
 0x318   : > { %1820 = vmatpush3.bf16.msra.mxu0 %v1254_v12  ;;  %1826 = vmatpush3.bf16.msra.mxu1 %v1300_v16 }
 0x319   : > { %1831 = vmatprep.subr.bf16.mxu0 %v1955_v15  ;;  %1837 = vmatprep.subr.bf16.mxu1 %v1955_v15 }
 0x3e1   : > { %v966_v32 = vpop.f32.mrb[0].mxu0  ;;  %v1012_v33 = vpop.f32.mrb[0].mxu1 }
 0x3e2   : > { %v2215_v34 = vsel %vm1119_vm8, %v966_v32, -1e+30  ;;  %v1799_v35 = vpop.f32.mrb[1].mxu0  ;;  %v2218_v36 = vsel %vm1119_vm8, %v1012_v33, -1e+30  ;;  %v1805_v37 = vpop.f32.mrb[1].mxu1 }
 0x3e3   : > { %v969_v38 = vpop.f32.mrb[2].mxu0  ;;  %v1128_v39 = vsel %vm925_vm6, %v2215_v34, -inf  ;;  %v1015_v40 = vpop.f32.mrb[2].mxu1  ;;  %v1131_v43 = vsel %vm925_vm6, %v2218_v36, -inf  ;;  %v1346_v32 = vsel %vm1252_vm10, %v1696_v27, 0 }
 0x3e4   : > { %1129 = vmax.xlane.f32.xlu0 %v1128_v39  ;;  %v1800_v41 = vpop.f32.mrb[3].mxu0  ;;  %v1806_v42 = vpop.f32.mrb[3].mxu1  ;;  %v1697_v33 = vld [vmem:[%s2037_s17 + $0x2c] sm:$0xf] }
 0x3e5   : > { %v1392_v38 = vsel %vm1252_vm10, %v1697_v33, 0 }
 0x3e8   : > { %1132 = vmax.xlane.f32.xlu0 %v1131_v43 }
 0x3e9   : > { %v1058_v44 = vpop.f32.mrb[4].mxu0  ;;  %v1104_v45 = vpop.f32.mrb[4].mxu1 }
 0x3ea   : > { %v2225_v46 = vsel %vm1119_vm8, %v1058_v44, -1e+30  ;;  %v1811_v47 = vpop.f32.mrb[5].mxu0  ;;  %v2228_v48 = vsel %vm1119_vm8, %v1104_v45, -1e+30  ;;  %v1817_v49 = vpop.f32.mrb[5].mxu1 }
 0x3eb   : > { %v1061_v50 = vpop.f32.mrb[6].mxu0  ;;  %v1134_v51 = vsel %vm925_vm6, %v2225_v46, -inf  ;;  %v1107_v52 = vpop.f32.mrb[6].mxu1  ;;  %v1137_v55 = vsel %vm925_vm6, %v2228_v48, -inf }
 0x3ec   : > { %1135 = vmax.xlane.f32.xlu1 %v1134_v51  ;;  %v1812_v53 = vpop.f32.mrb[7].mxu0  ;;  %v1818_v54 = vpop.f32.mrb[7].mxu1  ;;  %v1188_v50 = vld [vmem:[#allocation3] sm:$0xff] }
 0x3ed   : > { %v1189_v53 = vld [vmem:[#allocation3 + $0x8] sm:$0xff] }
 0x3f0   : > { %1138 = vmax.xlane.f32.xlu1 %v1137_v55 }
 0x471   : > { %v1130_v58 = vpop.xlane.xlu0 %1129 }
 0x472   : > { %v1140_v59 = vmax.f32 %v1124_v57, %v1130_v58 }
 0x474   : > { %v1144_v61 = vsub.f32 %v1124_v57, %v1140_v59  ;;  %1442 = vst.msk [vmem:[#allocation2] sm:$0xff] %vm1212_vm9, %v1140_v59  ;;  %1158 = vperm.xlu0 %1898, %v1140_v59   ;;  %v1190_v59 = vld [vmem:[#allocation3 + $0x10] sm:$0xff] }
 0x475   : > { %v1133_v62 = vpop.xlane.xlu0 %1132 }
 0x476   : > { %v1148_v63 = vmul.f32 1.442695, %v1144_v61  ;;  %v2238_v0 = vmax.f32 %v2234_v60, %v1133_v62  ;;  %v1191_v62 = vld [vmem:[#allocation3 + $0x18] sm:$0xff] }
 0x478   : > { %1900 = vpow2.f32 %v1148_v63  ;;  %v1145_v2 = vsub.f32 %v2234_v60, %v2238_v0  ;;  %1443 = vst.msk [vmem:[#allocation2 + $0x8] sm:$0xff] %vm1212_vm9, %v2238_v0  ;;  %1163 = vperm.xlu1 %1899, %v2238_v0  }
 0x479   : > { %v1136_v3 = vpop.xlane.xlu1 %1135 }
 0x47a   : > { %v1142_v5 = vmax.f32 %v1126_v1, %v1136_v3  ;;  %v1150_v42 = vmul.f32 1.442695, %v1145_v2  ;;  %v1217_v3 = vld [vmem:[#allocation4] sm:$0xff] }
 0x47c   : > { %v1146_v7 = vsub.f32 %v1126_v1, %v1142_v5  ;;  %1444 = vst.msk [vmem:[#allocation2 + $0x10] sm:$0xff] %vm1212_vm9, %v1142_v5  ;;  %1168 = vperm.xlu1 %1899, %v1142_v5  }
 0x47d   : > { %v1139_v8 = vpop.xlane.xlu1 %1138 }
 0x47e   : > { %v2249_v9 = vmax.f32 %v2245_v6, %v1139_v8  ;;  %v1152_v35 = vmul.f32 1.442695, %v1146_v7 }
 0x480   : > { %v1147_v10 = vsub.f32 %v2245_v6, %v2249_v9  ;;  %1445 = vst.msk [vmem:[#allocation2 + $0x18] sm:$0xff] %vm1212_vm9, %v2249_v9  ;;  %1173 = vperm.xlu1 %1899, %v2249_v9   ;;  %v1218_v6 = vld [vmem:[#allocation4 + $0x8] sm:$0xff] }
 0x482   : > { %v2258_v13 = vpop.eup %1900  ;;  %v1154_v47 = vmul.f32 1.442695, %v1147_v10 }
 0x483   : > { %v1192_v51 = vmul.f32 %v2258_v13, %v1188_v50 }
 0x484   : > { %1223 = vperm.xlu1 %1899, %v2258_v13  }
 0x4f3   : > { %v1159_v17 = vpop.permute.xlu0 %1158 }
 0x4f4   : > { %v1176_v18 = vsub.f32 %v2215_v34, %v1159_v17 }
 0x4f6   : > { %v1180_v19 = vmul.f32 1.442695, %v1176_v18 }
 0x4f7   : > { %v1164_v20 = vpop.permute.xlu1 %1163 }
 0x4f8   : > { %1902 = vpow2.f32 %v1180_v19  ;;  %v1177_v21 = vsub.f32 %v2218_v36, %v1164_v20 }
 0x4fa   : > { %v1182_v22 = vmul.f32 1.442695, %v1177_v21 }
 0x4fb   : > { %v1169_v23 = vpop.permute.xlu1 %1168 }
 0x4fc   : > { %1904 = vpow2.f32 %v1182_v22  ;;  %v1178_v24 = vsub.f32 %v2225_v46, %v1169_v23  ;;  %v1220_v22 = vld [vmem:[#allocation4 + $0x18] sm:$0xff] }
 0x4fe   : > { %v1184_v25 = vmul.f32 1.442695, %v1178_v24 }
 0x4ff   : > { %v1174_v4 = vpop.permute.xlu1 %1173 }
 0x500   : > { %1906 = vpow2.f32 %v1184_v25  ;;  %v1179_v26 = vsub.f32 %v2228_v48, %v1174_v4 }
 0x502   : > { %v1903_v28 = vpop.eup %1902  ;;  %v1186_v29 = vmul.f32 1.442695, %v1179_v26 }
 0x503   : > { %v1196_v30 = vsel %vm925_vm6, %v1903_v28, 0.0  ;;  %v1245_v31 = vpack.c.bf16 %v1903_v28, %v1903_v28  ;;  %v1224_v49 = vpop.permute.xlu1 %1223 }
 0x504   : > { %1908 = vpow2.f32 %v1186_v29  ;;  %1197 = vadd.xlane.f32.xlu1 %v1196_v30  ;;  %v1241_v5 = vmul.f32 %v1224_v49, %v1217_v3 }
 0x505   : > { %1822 = vmatmul.mubr.msk.bf16.vlgmr.msra.gmra.mrb[8].mxu0 %vm925_vm6, %v1245_v31  ;;  %1910 = vpow2.f32 %v1152_v35 }
 0x506   : > { %v1905_v34 = vpop.eup %1904  ;;  %1832 = vmatpush3.bf16.msra.mxu0 %v1346_v32  ;;  %1833 = vmatprep.mubr.msk.bf16.mxu0 %vm1956_vm7, %v1955_v15  ;;  %1912 = vpow2.f32 %v1150_v42 }
 0x507   : > { %v1199_v36 = vsel %vm925_vm6, %v1905_v34, 0.0  ;;  %v1246_v37 = vpack.c.bf16 %v1905_v34, %v1905_v34  ;;  %1914 = vpow2.f32 %v1154_v47 }
 0x508   : > { %1200 = vadd.xlane.f32.xlu0 %v1199_v36 }
 0x509   : > { %1828 = vmatmul.mubr.msk.bf16.vlgmr.msra.gmra.mrb[8].mxu1 %vm925_vm6, %v1246_v37 }
 0x50a   : > { %v1907_v39 = vpop.eup %1906  ;;  %1838 = vmatpush3.bf16.msra.mxu1 %v1392_v38  ;;  %1839 = vmatprep.mubr.msk.bf16.mxu1 %vm1956_vm7, %v1955_v15 }
 0x50b   : > { %v1247_v40 = vpack.c.bf16 %v1907_v39, %v1907_v39  ;;  %v1202_v46 = vsel %vm925_vm6, %v1907_v39, 0.0 }
 0x50d   : > { %1834 = vmatmul.mubr.msk.bf16.vlgmr.msra.gmra.mrb[12].mxu0 %vm925_vm6, %v1247_v40 }
 0x50e   : > { %v1909_v41 = vpop.eup %1908 }
 0x50f   : > { %v1248_v43 = vpack.c.bf16 %v1909_v41, %v1909_v41  ;;  %v1911_v44 = vpop.eup %1910  ;;  %v1205_v15 = vsel %vm925_vm6, %v1909_v41, 0.0 }
 0x510   : > { %v1913_v45 = vpop.eup %1912  ;;  %v1194_v60 = vmul.f32 %v1911_v44, %v1190_v59 }
 0x511   : > { %1840 = vmatmul.mubr.msk.bf16.vlgmr.msra.gmra.mrb[12].mxu1 %vm925_vm6, %v1248_v43  ;;  %v1915_v48 = vpop.eup %1914  ;;  %v1193_v55 = vmul.f32 %v1913_v45, %v1189_v53 }
 0x512   : > { %v1195_v0 = vmul.f32 %v1915_v48, %v1191_v62 }
 0x515   : > { %1233 = vperm.xlu1 %1899, %v1911_v44  }
 0x51e   : > { %1228 = vperm.xlu0 %1898, %v1913_v45  }
 0x539   : > { %1203 = vadd.xlane.f32.xlu1 %v1202_v46 }
 0x53d   : > { %1206 = vadd.xlane.f32.xlu1 %v1205_v15 }
 0x54e   : > { %1238 = vperm.xlu1 %1899, %v1915_v48  }
 0x591   : > { %v1198_v52 = vpop.xlane.xlu1 %1197 }
 0x592   : > { %v1208_v54 = vadd.f32 %v1198_v52, %v1192_v51 }
 0x594   : > { %1213 = vst.msk [vmem:[#allocation3] sm:$0xff] %vm1212_vm9, %v1208_v54 }
 0x595   : > { %v1201_v56 = vpop.xlane.xlu0 %1200  ;;  %v1234_v58 = vpop.permute.xlu1 %1233 }
 0x596   : > { %v1209_v57 = vadd.f32 %v1201_v56, %v1193_v55  ;;  %v1243_v20 = vmul.f32 %v1234_v58, %v1219_v14 }
 0x598   : > { %1214 = vst.msk [vmem:[#allocation3 + $0x8] sm:$0xff] %vm1212_vm9, %v1209_v57 }
 0x59d   : > { %v1229_v7 = vpop.permute.xlu0 %1228 }
 0x59e   : > { %v1242_v12 = vmul.f32 %v1229_v7, %v1218_v6 }
 0x5c6   : > { %v1204_v61 = vpop.xlane.xlu1 %1203 }
 0x5c7   : > { %v1210_v63 = vadd.f32 %v1204_v61, %v1194_v60 }
 0x5c9   : > { %1215 = vst.msk [vmem:[#allocation3 + $0x10] sm:$0xff] %vm1212_vm9, %v1210_v63 }
 0x5ca   : > { %v1207_v1 = vpop.xlane.xlu1 %1206 }
 0x5cb   : > { %v1211_v2 = vadd.f32 %v1207_v1, %v1195_v0 }
 0x5cd   : > { %1216 = vst.msk [vmem:[#allocation3 + $0x18] sm:$0xff] %vm1212_vm9, %v1211_v2 }
 0x5ce   : > { %v1239_v23 = vpop.permute.xlu1 %1238 }
 0x5cf   : > { %v1244_v27 = vmul.f32 %v1239_v23, %v1220_v22 }
 0x5d8   : > { %v1290_v8 = vpop.f32.mrb[8].mxu0 }
 0x5d9   : > { %v1434_v9 = vadd.f32 %v1290_v8, %v1241_v5  ;;  %v1823_v10 = vpop.f32.mrb[9].mxu0 }
 0x5da   : > { %v1293_v11 = vpop.f32.mrb[10].mxu0 }
 0x5db   : > { %1438 = vst.msk [vmem:[#allocation4] sm:$0xff] %vm925_vm6, %v1434_v9  ;;  %v1824_v13 = vpop.f32.mrb[11].mxu0 }
 0x5dc   : > { %v1336_v16 = vpop.f32.mrb[8].mxu1 }
 0x5dd   : > { %v1435_v17 = vadd.f32 %v1336_v16, %v1242_v12  ;;  %v1829_v18 = vpop.f32.mrb[9].mxu1 }
 0x5de   : > { %v1339_v19 = vpop.f32.mrb[10].mxu1 }
 0x5df   : > { %1439 = vst.msk [vmem:[#allocation4 + $0x8] sm:$0xff] %vm925_vm6, %v1435_v17  ;;  %v1830_v21 = vpop.f32.mrb[11].mxu1 }
 0x5e0   : > { %v1382_v24 = vpop.f32.mrb[12].mxu0 }
 0x5e1   : > { %v1436_v25 = vadd.f32 %v1382_v24, %v1243_v20  ;;  %v1835_v4 = vpop.f32.mrb[13].mxu0 }
 0x5e2   : > { %v1385_v26 = vpop.f32.mrb[14].mxu0 }
 0x5e3   : > { %1440 = vst.msk [vmem:[#allocation4 + $0x10] sm:$0xff] %vm925_vm6, %v1436_v25  ;;  %v1836_v28 = vpop.f32.mrb[15].mxu0 }
 0x5e4   : > { %v1428_v29 = vpop.f32.mrb[12].mxu1 }
 0x5e5   : > { %v1437_v30 = vadd.f32 %v1428_v29, %v1244_v27  ;;  %v1841_v31 = vpop.f32.mrb[13].mxu1 }
 0x5e6   : > { %v1431_v32 = vpop.f32.mrb[14].mxu1 }
 0x5e7   : > { %1441 = vst.msk [vmem:[#allocation4 + $0x18] sm:$0xff] %vm925_vm6, %v1437_v30  ;;  %v1842_v33 = vpop.f32.mrb[15].mxu1 }
 0x5e8 PF: > { %s1714_s1 = sadd.s32 8, %s2048_s26 }
 0x5e9   : > { %p1708_p10 = scmp.lt.s32.totalorder %s2052_s27, %s1714_s1 }
 0x5ea   : > { %v1453_v34 = vld [vmem:[#allocation3 + $0x8] sm:$0xff] (!%p1708_p10)  ;;  %v1455_v35 = vld [vmem:[#allocation3 + $0x18] sm:$0xff] (!%p1708_p10)  ;;  %v1454_v36 = vld [vmem:[#allocation3 + $0x10] sm:$0xff] (!%p1708_p10)  ;;  %v1958_v37 = vmov (!%p1708_p10), 0   ;;  %s1959_s25 = smov (!%p1708_p10), 8   ;;  %s1960_s29 = smov (!%p1708_p10), 16  }
 0x5eb   : > { %1451 = sbr.rel (%p1708_p10) target bundleno = 1780 (0x6f4), region = 48  ;;  %1916 = vset.pattern.permute.xlu0 (!%p1708_p10), %v1958_v37  ;;  %1917 = vset.pattern.permute.xlu1 (!%p1708_p10), %v1958_v37  ;;  %1918 = vrcp.f32 (!%p1708_p10), %v1453_v34  ;;  %v1452_v38 = vld [vmem:[#allocation3] sm:$0xff] (!%p1708_p10)  ;;  %v1461_v43 = vld [vmem:[#allocation4 + $0x8] sm:$0xff] (!%p1708_p10)  ;;  %v1462_v48 = vld [vmem:[#allocation4 + $0x10] sm:$0xff] (!%p1708_p10)  ;;  %s1961_s30 = smov (!%p1708_p10), 24   ;;  %vm1501_vm11 = vcmask (!%p1708_p10), 64512  }
 0x5ec   : > { %1920 = vrcp.f32 (!%p1708_p10), %v1455_v35  ;;  %v1460_v54 = vld [vmem:[#allocation4] sm:$0xff] (!%p1708_p10)  ;;  %vm1505_vm12 = vcmask (!%p1708_p10), 130048   ;;  %vm1508_vm13 = vcmask (!%p1708_p10), 195584   ;;  %vm1512_vm14 = vcmask (!%p1708_p10), 257024  }
 0x5ed   : > { %1922 = vrcp.f32 (!%p1708_p10), %v1454_v36 }
 0x5ee   : > { %1924 = vrcp.f32 (!%p1708_p10), %v1452_v38  ;;  %v1463_v44 = vld [vmem:[#allocation4 + $0x18] sm:$0xff] (!%p1708_p10) }
 0x5f5   : > { %v1919_v39 = vpop.eup %1918 }
 0x5f6   : > { %v1921_v40 = vpop.eup %1920  ;;  %1471 = vperm.xlu0 %1916, %v1919_v39  }
 0x5f7   : > { %v1923_v41 = vpop.eup %1922  ;;  %1481 = vperm.xlu1 %1917, %v1921_v40  }
 0x5f8   : > { %v1925_v42 = vpop.eup %1924 }
 0x5fa   : > { %1476 = vperm.xlu0 %1916, %v1923_v41  }
 0x5fb   : > { %1466 = vperm.xlu1 %1917, %v1925_v42  }
 0x675   : > { %v1472_v45 = vpop.permute.xlu0 %1471 }
 0x676   : > { %v1485_v46 = vmul.f32 %v1472_v45, %v1461_v43  ;;  %v1482_v15 = vpop.permute.xlu1 %1481 }
 0x677   : > { %v1487_v47 = vmul.f32 %v1482_v15, %v1463_v44 }
 0x678   : > { %v1489_v49 = vpack.c.bf16 %v1485_v46, %v1485_v46 }
 0x679   : > { %v1477_v50 = vpop.permute.xlu0 %1476  ;;  %v1491_v51 = vpack.c.bf16 %v1487_v47, %v1487_v47 }
 0x67a   : > { %v1486_v52 = vmul.f32 %v1477_v50, %v1462_v48  ;;  %1493 = vrot.lane.b32.xlu0 %v1489_v49, %s1959_s25  ;;  %v1467_v55 = vpop.permute.xlu1 %1466 }
 0x67b   : > { %v1484_v56 = vmul.f32 %v1467_v55, %v1460_v54 }
 0x67c   : > { %v1490_v53 = vpack.c.bf16 %v1486_v52, %v1486_v52 }
 0x67d   : > { %v1488_v58 = vpack.c.bf16 %v1484_v56, %v1484_v56 }
 0x67e   : > { %1496 = vrot.lane.b32.xlu1 %v1490_v53, %s1960_s29  ;;  %1499 = vrot.lane.b32.xlu0 %v1491_v51, %s1961_s30 }
 0x6ec   : > { %v1494_v57 = vpop.permute.xlu0 %1493 }
 0x6ed   : > { %v1504_v59 = vsel %vm1501_vm11, %v1488_v58, %v1494_v57 }
 0x6f0   : > { %v1497_v60 = vpop.permute.xlu1 %1496  ;;  %v1500_v61 = vpop.permute.xlu0 %1499 }
 0x6f1   : > { %v1507_v62 = vsel %vm1505_vm12, %v1504_v59, %v1497_v60 }
 0x6f2   : > { %v1510_v63 = vsel %vm1508_vm13, %v1507_v62, %v1500_v61 }
 0x6f3   : > { %1513 = vst.msk [vmem:[%s359_s21] sm:$0xf] %vm1512_vm14, %v1510_v63 }
 0x6f4 PF: > { %s17_s24 = sadd.s32 1, %s1948_s24   ;;  %s2322_s22 = smov %s1944_s23 }
 0x6f5   : > { %p14_p11 = scmp.ge.s32.totalorder %s17_s24, 4   ;;  %s2323_s23 = smov %s2325_s0 }
 0x6f7   :  { %16 = sbr.rel (!%p14_p11) target bundleno = 3 (0x3), region = 84 }

</bundles_post_ra>
